<compile_context>
chip_gen: v6e
topology: v6e:2x2x1
jax: 0.10.0
libtpu: 0.0.40
codegen_flags: <defaults>
</compile_context>

<pallas_src>
import math
import functools

import numpy as np
import jax
import jax.numpy as jnp
from jax import lax
from jax.experimental import pallas as pl
from jax.experimental.pallas import tpu as pltpu  # noqa: F401  (TPU backend assumed)

# ----------------------------- model dims ------------------------------------
BATCH = 2
TIME = 16
FEAT = 16
C1, C2 = 4, 8                         # conv channels
T1 = (TIME - 3) // 2 + 1              # 7  time after conv1
F1 = (FEAT - 3) // 2 + 1              # 7  freq after conv1
T2 = (T1 - 3) // 2 + 1                # 3  time after conv2
F2 = (F1 - 3) // 2 + 1                # 3  freq after conv2
EMBED_IN = C2 * F2                    # 24
D_MODEL = 32
N_HEADS = 4
D_HEAD = D_MODEL // N_HEADS
FFN = 64
VOCAB = 10
VOCAB_PAD = 128                       # lane-dense output; sliced in wrapper

M1 = BATCH * T1 * F1                  # 98  conv1 GEMM rows (n, t1, f1)
M2 = BATCH * T2 * F2                  # 18  conv2 GEMM rows (n, t2, f2)
M_SEQ = BATCH * T2                    # 6   real transformer rows (n, t2)
M_ROWS = 8                            # sublane-padded transformer rows
LANE = 128

# ----------------------- packed const-slab row layout ------------------------
ROW_W1 = 0        # (9, C1)        conv1 weight (im2col-major)
ROW_W2 = 16       # (C1, 9*C2)     conv2 weights, tap-concatenated
ROW_EMB = 24      # (C2, F2*D)     embed weights, freq-concatenated
ROW_QKV = 32      # (D, 3*D)       fused QKV
ROW_WO = 64       # (D, D)
ROW_FF1 = 96      # (D, FFN)
ROW_FF2 = 128     # (FFN, D)
ROW_PROJ = 192    # (D, VOCAB_PAD)
ROW_BIAS = 224    # 12 bias / LN rows, one per row
(B_CONV1, B_CONV2, B_EMB, B_LN1G, B_LN1B, B_QKV,
 B_ATTO, B_LN2G, B_LN2B, B_FF1, B_FF2, B_PROJ) = range(ROW_BIAS, ROW_BIAS + 12)
ROW_S2 = 240      # 9 blocks of 24 rows: conv2 tap selectors (18, 98) each
S2_BLOCK = 24
ROW_R3 = ROW_S2 + 9 * S2_BLOCK        # 456: 3 blocks of 8 rows: embed selectors (8, 18)
R3_BLOCK = 8
N_ROWS = ROW_R3 + F2 * R3_BLOCK       # 480


# ------------------ constant 0/1 selection matrices (numpy, once) ------------
def _build_conv2_selectors():
    # S[t] @ ycat_slice gathers, for conv-tap t=(kh,kw), the conv1 outputs that
    # feed each conv2 output position.  y1 rows are ordered (n, t1, f1).
    s = np.zeros((9, M2, M1), np.float32)
    for kh in range(3):
        for kw in range(3):
            t = kh * 3 + kw
            for n in range(BATCH):
                for p in range(T2):
                    for q in range(F2):
                        row = (n * T2 + p) * F2 + q
                        col = (n * T1 + 2 * p + kh) * F1 + (2 * q + kw)
                        s[t, row, col] = 1.0
    return s


def _build_embed_selectors_padded():
    # R[q] gathers, for freq position q, the conv2 outputs of every (batch,
    # time) row and places them into the sublane-padded (M_ROWS, ...) slab.
    r = np.zeros((F2, M_ROWS, M2), np.float32)
    for q in range(F2):
        for n in range(BATCH):
            for p in range(T2):
                row = n * T2 + p
                r[q, row, row * F2 + q] = 1.0
    return r


S2_SEL_NP = _build_conv2_selectors()        # (9, 18, 98)
R3_SEL_NP = _build_embed_selectors_padded()  # (3, 8, 18)


# ----------------------------- fused kernel ----------------------------------
def _fused_forward_kernel(w_ref, cols1_ref, mask_ref, o_ref):
    f32 = jnp.float32

    def row(r, n):                                   # (1, n) bias / LN vector
        return w_ref[r:r + 1, 0:n]

    def layer_norm(v, g, b):
        mean = jnp.mean(v, axis=-1, keepdims=True)
        c = v - mean
        var = jnp.mean(c * c, axis=-1, keepdims=True)
        return c * lax.rsqrt(var + 1e-5) * g + b

    # ---------------- encoder_embed: conv1 -> conv2 -> linear ----------------
    w1 = w_ref[ROW_W1:ROW_W1 + 9, 0:C1]
    y1 = jnp.dot(cols1_ref[...], w1, preferred_element_type=f32) + row(B_CONV1, C1)
    y1 = jnp.maximum(y1, 0.0)                                    # (98, 4)

    # one GEMM against tap-concatenated weights, then 9 independent selections
    w2cat = w_ref[ROW_W2:ROW_W2 + C1, 0:9 * C2]                  # (4, 72)
    ycat = jnp.dot(y1, w2cat, preferred_element_type=f32)        # (98, 72)
    y2 = row(B_CONV2, C2)                                        # (1, 8) broadcasts up
    for t in range(9):
        sel = w_ref[ROW_S2 + S2_BLOCK * t:ROW_S2 + S2_BLOCK * t + M2, 0:M1]
        y2 = y2 + jnp.dot(sel, ycat[:, C2 * t:C2 * (t + 1)],
                          preferred_element_type=f32)
    y2 = jnp.maximum(y2, 0.0)                                    # (18, 8)

    # one GEMM against freq-concatenated embed weights, then 3 placements
    embcat = w_ref[ROW_EMB:ROW_EMB + C2, 0:F2 * D_MODEL]         # (8, 96)
    ycat2 = jnp.dot(y2, embcat, preferred_element_type=f32)      # (18, 96)
    x = row(B_EMB, D_MODEL)                                      # (1, 32)
    for q in range(F2):
        r3 = w_ref[ROW_R3 + R3_BLOCK * q:ROW_R3 + R3_BLOCK * (q + 1), 0:M2]
        x = x + jnp.dot(r3, ycat2[:, D_MODEL * q:D_MODEL * (q + 1)],
                        preferred_element_type=f32)
    # x: (M_ROWS=8, D_MODEL); rows 0..5 are real (batch, time), rows 6..7 pad

    # ---------------- transformer layer (pre-LN, batch-fused attention) ------
    xn = layer_norm(x, row(B_LN1G, D_MODEL), row(B_LN1B, D_MODEL))

    wqkv = w_ref[ROW_QKV:ROW_QKV + D_MODEL, 0:3 * D_MODEL]
    qkv = jnp.dot(xn, wqkv, preferred_element_type=f32) + row(B_QKV, 3 * D_MODEL)
    q_all = qkv[:, 0:D_MODEL]
    k_all = qkv[:, D_MODEL:2 * D_MODEL]
    v_all = qkv[:, 2 * D_MODEL:3 * D_MODEL]

    mask = mask_ref[...]                                         # (8, 8) additive
    scale = 1.0 / math.sqrt(D_HEAD)
    ctx_heads = []
    for h in range(N_HEADS):
        c0 = h * D_HEAD
        qh = q_all[:, c0:c0 + D_HEAD]
        kh = k_all[:, c0:c0 + D_HEAD]
        vh = v_all[:, c0:c0 + D_HEAD]
        s = lax.dot_general(qh, kh, (((1,), (1,)), ((), ())),
                            preferred_element_type=f32) * scale + mask
        m = jnp.max(s, axis=-1, keepdims=True)
        p = jnp.exp(s - m)
        denom = jnp.sum(p, axis=-1, keepdims=True)
        p = p * pl.reciprocal(denom, approx=True)                # EUP, not VPU divide
        ctx_heads.append(jnp.dot(p, vh, preferred_element_type=f32))  # (8, 8)
    ctx = jnp.concatenate(ctx_heads, axis=-1)                    # (8, 32)

    wo = w_ref[ROW_WO:ROW_WO + D_MODEL, 0:D_MODEL]
    x = x + jnp.dot(ctx, wo, preferred_element_type=f32) + row(B_ATTO, D_MODEL)

    # ---- feed-forward sublayer ----
    xn2 = layer_norm(x, row(B_LN2G, D_MODEL), row(B_LN2B, D_MODEL))
    f1w = w_ref[ROW_FF1:ROW_FF1 + D_MODEL, 0:FFN]
    h1 = jnp.maximum(jnp.dot(xn2, f1w, preferred_element_type=f32) + row(B_FF1, FFN), 0.0)
    f2w = w_ref[ROW_FF2:ROW_FF2 + FFN, 0:D_MODEL]
    x = x + jnp.dot(h1, f2w, preferred_element_type=f32) + row(B_FF2, D_MODEL)

    # ---------------- vocab projection, full (8, 128) unmasked store ---------
    projw = w_ref[ROW_PROJ:ROW_PROJ + D_MODEL, 0:VOCAB_PAD]
    logits = jnp.dot(x, projw, preferred_element_type=f32) + row(B_PROJ, VOCAB_PAD)
    o_ref[...] = logits.astype(o_ref.dtype)


# ----------------------------- wrapper-side helpers ---------------------------
def _im2col_3x3_s2(x):
    """x: (N, H, W) single channel -> (N*Ho*Wo, 9), tap order (kh, kw)."""
    N, H, W = x.shape
    Ho = (H - 3) // 2 + 1
    Wo = (W - 3) // 2 + 1
    taps = []
    for kh in range(3):
        for kw in range(3):
            taps.append(
                lax.slice(x, (0, kh, kw),
                          (N, kh + 2 * (Ho - 1) + 1, kw + 2 * (Wo - 1) + 1),
                          (1, 2, 2)))                            # (N, Ho, Wo)
    cols = jnp.stack(taps, axis=-1)                              # (N, Ho, Wo, 9)
    return cols.reshape(N * Ho * Wo, 9)


def _build_attn_mask(lens2):
    """Additive (M_ROWS, M_ROWS) mask: block-diagonal over batches + key pad."""
    rows = jnp.arange(M_ROWS)
    valid = rows < M_SEQ
    rb = jnp.minimum(rows // T2, BATCH - 1)
    rt = rows % T2
    key_valid = valid & (rt < lens2[rb])
    same = (rb[:, None] == rb[None, :]) & valid[:, None] & valid[None, :]
    allowed = same & key_valid[None, :]
    return jnp.where(allowed, 0.0, -1e30).astype(jnp.float32)


def _pack_const_slab(params):
    """All weights / biases / selectors packed into one (N_ROWS, 128) slab."""
    slab = jnp.zeros((N_ROWS, LANE), jnp.float32)

    def put(s, r, mat):
        mat = jnp.asarray(mat, jnp.float32)
        if mat.ndim == 1:
            mat = mat[None, :]
        return s.at[r:r + mat.shape[0], 0:mat.shape[1]].set(mat)

    w1mat = params["conv1_w"].reshape(C1, 9).T                               # (9, C1)
    w2taps = params["conv2_w"].transpose(2, 3, 1, 0).reshape(9, C1, C2)
    w2cat = jnp.concatenate([w2taps[t] for t in range(9)], axis=1)           # (C1, 72)
    embcat = jnp.concatenate([params["embed_w"][q::F2] for q in range(F2)],
                             axis=1)                                         # (C2, 96)
    wqkv = jnp.concatenate([params["wq"], params["wk"], params["wv"]], axis=1)
    bqkv = jnp.concatenate([params["bq"], params["bk"], params["bv"]])
    projw = jnp.zeros((D_MODEL, VOCAB_PAD), jnp.float32).at[:, :VOCAB].set(params["proj_w"])
    projb = jnp.zeros((VOCAB_PAD,), jnp.float32).at[:VOCAB].set(params["proj_b"])

    slab = put(slab, ROW_W1, w1mat)
    slab = put(slab, ROW_W2, w2cat)
    slab = put(slab, ROW_EMB, embcat)
    slab = put(slab, ROW_QKV, wqkv)
    slab = put(slab, ROW_WO, params["wo"])
    slab = put(slab, ROW_FF1, params["ffn1_w"])
    slab = put(slab, ROW_FF2, params["ffn2_w"])
    slab = put(slab, ROW_PROJ, projw)

    slab = put(slab, B_CONV1, params["conv1_b"])
    slab = put(slab, B_CONV2, params["conv2_b"])
    slab = put(slab, B_EMB, params["embed_b"])
    slab = put(slab, B_LN1G, params["ln1_g"])
    slab = put(slab, B_LN1B, params["ln1_b"])
    slab = put(slab, B_QKV, bqkv)
    slab = put(slab, B_ATTO, params["bo"])
    slab = put(slab, B_LN2G, params["ln2_g"])
    slab = put(slab, B_LN2B, params["ln2_b"])
    slab = put(slab, B_FF1, params["ffn1_b"])
    slab = put(slab, B_FF2, params["ffn2_b"])
    slab = put(slab, B_PROJ, projb)

    for t in range(9):
        slab = put(slab, ROW_S2 + S2_BLOCK * t, S2_SEL_NP[t])
    for q in range(F2):
        slab = put(slab, ROW_R3 + R3_BLOCK * q, R3_SEL_NP[q])
    return slab


# ----------------------------- parameters ------------------------------------
def init_params(key):
    def w(k, shape):
        fan_in = shape[0] if len(shape) == 2 else shape[1] * shape[2] * shape[3]
        return jax.random.normal(k, shape, dtype=jnp.float32) / math.sqrt(fan_in)

    ks = iter(jax.random.split(key, 12))
    p = {
        "conv1_w": w(next(ks), (C1, 1, 3, 3)),
        "conv1_b": jnp.zeros((C1,), jnp.float32),
        "conv2_w": w(next(ks), (C2, C1, 3, 3)),
        "conv2_b": jnp.zeros((C2,), jnp.float32),
        "embed_w": w(next(ks), (EMBED_IN, D_MODEL)),
        "embed_b": jnp.zeros((D_MODEL,), jnp.float32),
        "ln1_g": jnp.ones((D_MODEL,), jnp.float32),
        "ln1_b": jnp.zeros((D_MODEL,), jnp.float32),
        "ln2_g": jnp.ones((D_MODEL,), jnp.float32),
        "ln2_b": jnp.zeros((D_MODEL,), jnp.float32),
        "wq": w(next(ks), (D_MODEL, D_MODEL)), "bq": jnp.zeros((D_MODEL,), jnp.float32),
        "wk": w(next(ks), (D_MODEL, D_MODEL)), "bk": jnp.zeros((D_MODEL,), jnp.float32),
        "wv": w(next(ks), (D_MODEL, D_MODEL)), "bv": jnp.zeros((D_MODEL,), jnp.float32),
        "wo": w(next(ks), (D_MODEL, D_MODEL)), "bo": jnp.zeros((D_MODEL,), jnp.float32),
        "ffn1_w": w(next(ks), (D_MODEL, FFN)), "ffn1_b": jnp.zeros((FFN,), jnp.float32),
        "ffn2_w": w(next(ks), (FFN, D_MODEL)), "ffn2_b": jnp.zeros((D_MODEL,), jnp.float32),
        "proj_w": w(next(ks), (D_MODEL, VOCAB)), "proj_b": jnp.zeros((VOCAB,), jnp.float32),
    }
    return p


# ----------------------------- Model.forward ----------------------------------
def model_forward(params, feature, feature_lens):
    # output lengths (trivial integer math stays in XLA)
    lens1 = (feature_lens - 3) // 2 + 1
    lens2 = (lens1 - 3) // 2 + 1

    cols1 = _im2col_3x3_s2(feature)        # (M1, 9)   input-dependent
    mask = _build_attn_mask(lens2)         # (8, 8)    length-dependent
    slab = _pack_const_slab(params)        # (480,128) folds to a constant under jit

    out = pl.pallas_call(
        _fused_forward_kernel,
        out_shape=jax.ShapeDtypeStruct((M_ROWS, VOCAB_PAD), jnp.float32),
    )(slab, cols1, mask)

    logits = out[:M_SEQ, :VOCAB].reshape(BATCH, T2, VOCAB)
    return logits, lens2


# ----------------------------- main -------------------------------------------
if __name__ == "__main__":
    key = jax.random.PRNGKey(0)
    pkey, fkey = jax.random.split(key)
    params = init_params(pkey)

    feature = jax.random.normal(fkey, (BATCH, TIME, FEAT), dtype=jnp.float32)
    feature_lens = jnp.array([16, 12], dtype=jnp.int32)

    fwd = jax.jit(functools.partial(model_forward, params))
    logits, out_lens = fwd(feature, feature_lens)
    jax.block_until_ready((logits, out_lens))

    assert logits.shape == (BATCH, T2, VOCAB), logits.shape
    assert out_lens.shape == (BATCH,), out_lens.shape
    assert bool(jnp.all(jnp.isfinite(logits)))
    print("KERNEL_OK")
</pallas_src>

<mosaic_0001>
module attributes {stable_mosaic.version = 11 : i64} {
  func.func @_fused_forward_kernel(%arg0: memref<480x128xf32, #tpu.memory_space<vmem>>, %arg1: memref<98x9xf32, #tpu.memory_space<vmem>>, %arg2: memref<8x8xf32, #tpu.memory_space<vmem>>, %arg3: memref<8x128xf32, #tpu.memory_space<vmem>>) attributes {dimension_semantics = [], scalar_prefetch = 0 : i64, scratch_operands = 0 : i64, tpu.core_type = #tpu.core_type<tc>} {
    %c0 = arith.constant 0 : index
    %c0_0 = arith.constant 0 : index
    %0 = vector.load %arg0[%c0, %c0_0] : memref<480x128xf32, #tpu.memory_space<vmem>>, vector<9x4xf32>
    %c0_1 = arith.constant 0 : index
    %c0_2 = arith.constant 0 : index
    %1 = vector.load %arg1[%c0_1, %c0_2] : memref<98x9xf32, #tpu.memory_space<vmem>>, vector<98x9xf32>
    %cst = arith.constant dense<0.000000e+00> : vector<98x4xf32>
    %2 = tpu.matmul %1, %0, %cst {dimension_numbers = #tpu.dot_dimension_numbers<[1], [0], [0], [1], [0, 0, 1, 1], [], []>} : vector<98x9xf32>, vector<9x4xf32>, vector<98x4xf32> -> vector<98x4xf32>
    %c224 = arith.constant 224 : index
    %c0_3 = arith.constant 0 : index
    %3 = vector.load %arg0[%c224, %c0_3] : memref<480x128xf32, #tpu.memory_space<vmem>>, vector<1x4xf32>
    %4 = vector.broadcast %3 : vector<1x4xf32> to vector<98x4xf32>
    %5 = arith.addf %2, %4 : vector<98x4xf32>
    %cst_4 = arith.constant 0.000000e+00 : f32
    %6 = vector.broadcast %cst_4 : f32 to vector<98x4xf32>
    %7 = arith.maximumf %5, %6 : vector<98x4xf32>
    %c16 = arith.constant 16 : index
    %c0_5 = arith.constant 0 : index
    %8 = vector.load %arg0[%c16, %c0_5] : memref<480x128xf32, #tpu.memory_space<vmem>>, vector<4x72xf32>
    %cst_6 = arith.constant dense<0.000000e+00> : vector<98x72xf32>
    %9 = tpu.matmul %7, %8, %cst_6 {dimension_numbers = #tpu.dot_dimension_numbers<[1], [0], [0], [1], [0, 0, 1, 1], [], []>} : vector<98x4xf32>, vector<4x72xf32>, vector<98x72xf32> -> vector<98x72xf32>
    %c225 = arith.constant 225 : index
    %c0_7 = arith.constant 0 : index
    %10 = vector.load %arg0[%c225, %c0_7] : memref<480x128xf32, #tpu.memory_space<vmem>>, vector<1x8xf32>
    %c240 = arith.constant 240 : index
    %c0_8 = arith.constant 0 : index
    %11 = vector.load %arg0[%c240, %c0_8] : memref<480x128xf32, #tpu.memory_space<vmem>>, vector<18x98xf32>
    %12 = vector.extract_strided_slice %9 {offsets = [0, 0], sizes = [98, 8], strides = [1, 1]} : vector<98x72xf32> to vector<98x8xf32>
    %cst_9 = arith.constant dense<0.000000e+00> : vector<18x8xf32>
    %13 = tpu.matmul %11, %12, %cst_9 {dimension_numbers = #tpu.dot_dimension_numbers<[1], [0], [0], [1], [0, 0, 1, 1], [], []>} : vector<18x98xf32>, vector<98x8xf32>, vector<18x8xf32> -> vector<18x8xf32>
    %14 = vector.broadcast %10 : vector<1x8xf32> to vector<18x8xf32>
    %15 = arith.addf %14, %13 : vector<18x8xf32>
    %c264 = arith.constant 264 : index
    %c0_10 = arith.constant 0 : index
    %16 = vector.load %arg0[%c264, %c0_10] : memref<480x128xf32, #tpu.memory_space<vmem>>, vector<18x98xf32>
    %17 = vector.extract_strided_slice %9 {offsets = [0, 8], sizes = [98, 8], strides = [1, 1]} : vector<98x72xf32> to vector<98x8xf32>
    %cst_11 = arith.constant dense<0.000000e+00> : vector<18x8xf32>
    %18 = tpu.matmul %16, %17, %cst_11 {dimension_numbers = #tpu.dot_dimension_numbers<[1], [0], [0], [1], [0, 0, 1, 1], [], []>} : vector<18x98xf32>, vector<98x8xf32>, vector<18x8xf32> -> vector<18x8xf32>
    %19 = arith.addf %15, %18 : vector<18x8xf32>
    %c288 = arith.constant 288 : index
    %c0_12 = arith.constant 0 : index
    %20 = vector.load %arg0[%c288, %c0_12] : memref<480x128xf32, #tpu.memory_space<vmem>>, vector<18x98xf32>
    %21 = vector.extract_strided_slice %9 {offsets = [0, 16], sizes = [98, 8], strides = [1, 1]} : vector<98x72xf32> to vector<98x8xf32>
    %cst_13 = arith.constant dense<0.000000e+00> : vector<18x8xf32>
    %22 = tpu.matmul %20, %21, %cst_13 {dimension_numbers = #tpu.dot_dimension_numbers<[1], [0], [0], [1], [0, 0, 1, 1], [], []>} : vector<18x98xf32>, vector<98x8xf32>, vector<18x8xf32> -> vector<18x8xf32>
    %23 = arith.addf %19, %22 : vector<18x8xf32>
    %c312 = arith.constant 312 : index
    %c0_14 = arith.constant 0 : index
    %24 = vector.load %arg0[%c312, %c0_14] : memref<480x128xf32, #tpu.memory_space<vmem>>, vector<18x98xf32>
    %25 = vector.extract_strided_slice %9 {offsets = [0, 24], sizes = [98, 8], strides = [1, 1]} : vector<98x72xf32> to vector<98x8xf32>
    %cst_15 = arith.constant dense<0.000000e+00> : vector<18x8xf32>
    %26 = tpu.matmul %24, %25, %cst_15 {dimension_numbers = #tpu.dot_dimension_numbers<[1], [0], [0], [1], [0, 0, 1, 1], [], []>} : vector<18x98xf32>, vector<98x8xf32>, vector<18x8xf32> -> vector<18x8xf32>
    %27 = arith.addf %23, %26 : vector<18x8xf32>
    %c336 = arith.constant 336 : index
    %c0_16 = arith.constant 0 : index
    %28 = vector.load %arg0[%c336, %c0_16] : memref<480x128xf32, #tpu.memory_space<vmem>>, vector<18x98xf32>
    %29 = vector.extract_strided_slice %9 {offsets = [0, 32], sizes = [98, 8], strides = [1, 1]} : vector<98x72xf32> to vector<98x8xf32>
    %cst_17 = arith.constant dense<0.000000e+00> : vector<18x8xf32>
    %30 = tpu.matmul %28, %29, %cst_17 {dimension_numbers = #tpu.dot_dimension_numbers<[1], [0], [0], [1], [0, 0, 1, 1], [], []>} : vector<18x98xf32>, vector<98x8xf32>, vector<18x8xf32> -> vector<18x8xf32>
    %31 = arith.addf %27, %30 : vector<18x8xf32>
    %c360 = arith.constant 360 : index
    %c0_18 = arith.constant 0 : index
    %32 = vector.load %arg0[%c360, %c0_18] : memref<480x128xf32, #tpu.memory_space<vmem>>, vector<18x98xf32>
    %33 = vector.extract_strided_slice %9 {offsets = [0, 40], sizes = [98, 8], strides = [1, 1]} : vector<98x72xf32> to vector<98x8xf32>
    %cst_19 = arith.constant dense<0.000000e+00> : vector<18x8xf32>
    %34 = tpu.matmul %32, %33, %cst_19 {dimension_numbers = #tpu.dot_dimension_numbers<[1], [0], [0], [1], [0, 0, 1, 1], [], []>} : vector<18x98xf32>, vector<98x8xf32>, vector<18x8xf32> -> vector<18x8xf32>
    %35 = arith.addf %31, %34 : vector<18x8xf32>
    %c384 = arith.constant 384 : index
    %c0_20 = arith.constant 0 : index
    %36 = vector.load %arg0[%c384, %c0_20] : memref<480x128xf32, #tpu.memory_space<vmem>>, vector<18x98xf32>
    %37 = vector.extract_strided_slice %9 {offsets = [0, 48], sizes = [98, 8], strides = [1, 1]} : vector<98x72xf32> to vector<98x8xf32>
    %cst_21 = arith.constant dense<0.000000e+00> : vector<18x8xf32>
    %38 = tpu.matmul %36, %37, %cst_21 {dimension_numbers = #tpu.dot_dimension_numbers<[1], [0], [0], [1], [0, 0, 1, 1], [], []>} : vector<18x98xf32>, vector<98x8xf32>, vector<18x8xf32> -> vector<18x8xf32>
    %39 = arith.addf %35, %38 : vector<18x8xf32>
    %c408 = arith.constant 408 : index
    %c0_22 = arith.constant 0 : index
    %40 = vector.load %arg0[%c408, %c0_22] : memref<480x128xf32, #tpu.memory_space<vmem>>, vector<18x98xf32>
    %41 = vector.extract_strided_slice %9 {offsets = [0, 56], sizes = [98, 8], strides = [1, 1]} : vector<98x72xf32> to vector<98x8xf32>
    %cst_23 = arith.constant dense<0.000000e+00> : vector<18x8xf32>
    %42 = tpu.matmul %40, %41, %cst_23 {dimension_numbers = #tpu.dot_dimension_numbers<[1], [0], [0], [1], [0, 0, 1, 1], [], []>} : vector<18x98xf32>, vector<98x8xf32>, vector<18x8xf32> -> vector<18x8xf32>
    %43 = arith.addf %39, %42 : vector<18x8xf32>
    %c432 = arith.constant 432 : index
    %c0_24 = arith.constant 0 : index
    %44 = vector.load %arg0[%c432, %c0_24] : memref<480x128xf32, #tpu.memory_space<vmem>>, vector<18x98xf32>
    %45 = vector.extract_strided_slice %9 {offsets = [0, 64], sizes = [98, 8], strides = [1, 1]} : vector<98x72xf32> to vector<98x8xf32>
    %cst_25 = arith.constant dense<0.000000e+00> : vector<18x8xf32>
    %46 = tpu.matmul %44, %45, %cst_25 {dimension_numbers = #tpu.dot_dimension_numbers<[1], [0], [0], [1], [0, 0, 1, 1], [], []>} : vector<18x98xf32>, vector<98x8xf32>, vector<18x8xf32> -> vector<18x8xf32>
    %47 = arith.addf %43, %46 : vector<18x8xf32>
    %cst_26 = arith.constant 0.000000e+00 : f32
    %48 = vector.broadcast %cst_26 : f32 to vector<18x8xf32>
    %49 = arith.maximumf %47, %48 : vector<18x8xf32>
    %c24 = arith.constant 24 : index
    %c0_27 = arith.constant 0 : index
    %50 = vector.load %arg0[%c24, %c0_27] : memref<480x128xf32, #tpu.memory_space<vmem>>, vector<8x96xf32>
    %cst_28 = arith.constant dense<0.000000e+00> : vector<18x96xf32>
    %51 = tpu.matmul %49, %50, %cst_28 {dimension_numbers = #tpu.dot_dimension_numbers<[1], [0], [0], [1], [0, 0, 1, 1], [], []>} : vector<18x8xf32>, vector<8x96xf32>, vector<18x96xf32> -> vector<18x96xf32>
    %c226 = arith.constant 226 : index
    %c0_29 = arith.constant 0 : index
    %52 = vector.load %arg0[%c226, %c0_29] : memref<480x128xf32, #tpu.memory_space<vmem>>, vector<1x32xf32>
    %c456 = arith.constant 456 : index
    %c0_30 = arith.constant 0 : index
    %53 = vector.load %arg0[%c456, %c0_30] : memref<480x128xf32, #tpu.memory_space<vmem>>, vector<8x18xf32>
    %54 = vector.extract_strided_slice %51 {offsets = [0, 0], sizes = [18, 32], strides = [1, 1]} : vector<18x96xf32> to vector<18x32xf32>
    %cst_31 = arith.constant dense<0.000000e+00> : vector<8x32xf32>
    %55 = tpu.matmul %53, %54, %cst_31 {dimension_numbers = #tpu.dot_dimension_numbers<[1], [0], [0], [1], [0, 0, 1, 1], [], []>} : vector<8x18xf32>, vector<18x32xf32>, vector<8x32xf32> -> vector<8x32xf32>
    %56 = vector.broadcast %52 : vector<1x32xf32> to vector<8x32xf32>
    %57 = arith.addf %56, %55 : vector<8x32xf32>
    %c464 = arith.constant 464 : index
    %c0_32 = arith.constant 0 : index
    %58 = vector.load %arg0[%c464, %c0_32] : memref<480x128xf32, #tpu.memory_space<vmem>>, vector<8x18xf32>
    %59 = vector.extract_strided_slice %51 {offsets = [0, 32], sizes = [18, 32], strides = [1, 1]} : vector<18x96xf32> to vector<18x32xf32>
    %cst_33 = arith.constant dense<0.000000e+00> : vector<8x32xf32>
    %60 = tpu.matmul %58, %59, %cst_33 {dimension_numbers = #tpu.dot_dimension_numbers<[1], [0], [0], [1], [0, 0, 1, 1], [], []>} : vector<8x18xf32>, vector<18x32xf32>, vector<8x32xf32> -> vector<8x32xf32>
    %61 = arith.addf %57, %60 : vector<8x32xf32>
    %c472 = arith.constant 472 : index
    %c0_34 = arith.constant 0 : index
    %62 = vector.load %arg0[%c472, %c0_34] : memref<480x128xf32, #tpu.memory_space<vmem>>, vector<8x18xf32>
    %63 = vector.extract_strided_slice %51 {offsets = [0, 64], sizes = [18, 32], strides = [1, 1]} : vector<18x96xf32> to vector<18x32xf32>
    %cst_35 = arith.constant dense<0.000000e+00> : vector<8x32xf32>
    %64 = tpu.matmul %62, %63, %cst_35 {dimension_numbers = #tpu.dot_dimension_numbers<[1], [0], [0], [1], [0, 0, 1, 1], [], []>} : vector<8x18xf32>, vector<18x32xf32>, vector<8x32xf32> -> vector<8x32xf32>
    %65 = arith.addf %61, %64 : vector<8x32xf32>
    %c227 = arith.constant 227 : index
    %c0_36 = arith.constant 0 : index
    %66 = vector.load %arg0[%c227, %c0_36] : memref<480x128xf32, #tpu.memory_space<vmem>>, vector<1x32xf32>
    %c228 = arith.constant 228 : index
    %c0_37 = arith.constant 0 : index
    %67 = vector.load %arg0[%c228, %c0_37] : memref<480x128xf32, #tpu.memory_space<vmem>>, vector<1x32xf32>
    %cst_38 = arith.constant dense<0.000000e+00> : vector<8xf32>
    %68 = vector.multi_reduction <add>, %65, %cst_38 [1] : vector<8x32xf32> to vector<8xf32>
    %69 = vector.shape_cast %68 : vector<8xf32> to vector<8x1xf32>
    %cst_39 = arith.constant 3.200000e+01 : f32
    %70 = vector.broadcast %cst_39 : f32 to vector<8x1xf32>
    %71 = arith.divf %69, %70 : vector<8x1xf32>
    %72 = vector.broadcast %71 : vector<8x1xf32> to vector<8x32xf32>
    %73 = arith.subf %65, %72 : vector<8x32xf32>
    %74 = arith.mulf %73, %73 : vector<8x32xf32>
    %cst_40 = arith.constant dense<0.000000e+00> : vector<8xf32>
    %75 = vector.multi_reduction <add>, %74, %cst_40 [1] : vector<8x32xf32> to vector<8xf32>
    %76 = vector.shape_cast %75 : vector<8xf32> to vector<8x1xf32>
    %cst_41 = arith.constant 3.200000e+01 : f32
    %77 = vector.broadcast %cst_41 : f32 to vector<8x1xf32>
    %78 = arith.divf %76, %77 : vector<8x1xf32>
    %cst_42 = arith.constant 9.99999974E-6 : f32
    %79 = vector.broadcast %cst_42 : f32 to vector<8x1xf32>
    %80 = arith.addf %78, %79 : vector<8x1xf32>
    %81 = math.rsqrt %80 : vector<8x1xf32>
    %82 = vector.broadcast %81 : vector<8x1xf32> to vector<8x32xf32>
    %83 = arith.mulf %73, %82 : vector<8x32xf32>
    %84 = vector.broadcast %66 : vector<1x32xf32> to vector<8x32xf32>
    %85 = arith.mulf %83, %84 : vector<8x32xf32>
    %86 = vector.broadcast %67 : vector<1x32xf32> to vector<8x32xf32>
    %87 = arith.addf %85, %86 : vector<8x32xf32>
    %c32 = arith.constant 32 : index
    %c0_43 = arith.constant 0 : index
    %88 = vector.load %arg0[%c32, %c0_43] : memref<480x128xf32, #tpu.memory_space<vmem>>, vector<32x96xf32>
    %cst_44 = arith.constant dense<0.000000e+00> : vector<8x96xf32>
    %89 = tpu.matmul %87, %88, %cst_44 {dimension_numbers = #tpu.dot_dimension_numbers<[1], [0], [0], [1], [0, 0, 1, 1], [], []>} : vector<8x32xf32>, vector<32x96xf32>, vector<8x96xf32> -> vector<8x96xf32>
    %c229 = arith.constant 229 : index
    %c0_45 = arith.constant 0 : index
    %90 = vector.load %arg0[%c229, %c0_45] : memref<480x128xf32, #tpu.memory_space<vmem>>, vector<1x96xf32>
    %91 = vector.broadcast %90 : vector<1x96xf32> to vector<8x96xf32>
    %92 = arith.addf %89, %91 : vector<8x96xf32>
    %93 = vector.extract_strided_slice %92 {offsets = [0, 0], sizes = [8, 32], strides = [1, 1]} : vector<8x96xf32> to vector<8x32xf32>
    %94 = vector.extract_strided_slice %92 {offsets = [0, 32], sizes = [8, 32], strides = [1, 1]} : vector<8x96xf32> to vector<8x32xf32>
    %95 = vector.extract_strided_slice %92 {offsets = [0, 64], sizes = [8, 32], strides = [1, 1]} : vector<8x96xf32> to vector<8x32xf32>
    %c0_46 = arith.constant 0 : index
    %c0_47 = arith.constant 0 : index
    %96 = vector.load %arg2[%c0_46, %c0_47] : memref<8x8xf32, #tpu.memory_space<vmem>>, vector<8x8xf32>
    %97 = vector.extract_strided_slice %93 {offsets = [0, 0], sizes = [8, 8], strides = [1, 1]} : vector<8x32xf32> to vector<8x8xf32>
    %98 = vector.extract_strided_slice %94 {offsets = [0, 0], sizes = [8, 8], strides = [1, 1]} : vector<8x32xf32> to vector<8x8xf32>
    %99 = vector.extract_strided_slice %95 {offsets = [0, 0], sizes = [8, 8], strides = [1, 1]} : vector<8x32xf32> to vector<8x8xf32>
    %cst_48 = arith.constant dense<0.000000e+00> : vector<8x8xf32>
    %100 = tpu.matmul %97, %98, %cst_48 {dimension_numbers = #tpu.dot_dimension_numbers<[1], [1], [0], [0], [0, 0, 1, 0], [], []>} : vector<8x8xf32>, vector<8x8xf32>, vector<8x8xf32> -> vector<8x8xf32>
    %cst_49 = arith.constant 0.353553385 : f32
    %101 = vector.broadcast %cst_49 : f32 to vector<8x8xf32>
    %102 = arith.mulf %100, %101 : vector<8x8xf32>
    %103 = arith.addf %102, %96 : vector<8x8xf32>
    %cst_50 = arith.constant dense<0xFF800000> : vector<8xf32>
    %104 = vector.multi_reduction <maximumf>, %103, %cst_50 [1] : vector<8x8xf32> to vector<8xf32>
    %105 = vector.shape_cast %104 : vector<8xf32> to vector<8x1xf32>
    %106 = vector.broadcast %105 : vector<8x1xf32> to vector<8x8xf32>
    %107 = arith.subf %103, %106 : vector<8x8xf32>
    %108 = math.exp %107 : vector<8x8xf32>
    %cst_51 = arith.constant dense<0.000000e+00> : vector<8xf32>
    %109 = vector.multi_reduction <add>, %108, %cst_51 [1] : vector<8x8xf32> to vector<8xf32>
    %110 = vector.shape_cast %109 : vector<8xf32> to vector<8x1xf32>
    %111 = tpu.reciprocal %110 {approx = true} : vector<8x1xf32> -> vector<8x1xf32>
    %112 = vector.broadcast %111 : vector<8x1xf32> to vector<8x8xf32>
    %113 = arith.mulf %108, %112 : vector<8x8xf32>
    %cst_52 = arith.constant dense<0.000000e+00> : vector<8x8xf32>
    %114 = tpu.matmul %113, %99, %cst_52 {dimension_numbers = #tpu.dot_dimension_numbers<[1], [0], [0], [1], [0, 0, 1, 1], [], []>} : vector<8x8xf32>, vector<8x8xf32>, vector<8x8xf32> -> vector<8x8xf32>
    %115 = vector.extract_strided_slice %93 {offsets = [0, 8], sizes = [8, 8], strides = [1, 1]} : vector<8x32xf32> to vector<8x8xf32>
    %116 = vector.extract_strided_slice %94 {offsets = [0, 8], sizes = [8, 8], strides = [1, 1]} : vector<8x32xf32> to vector<8x8xf32>
    %117 = vector.extract_strided_slice %95 {offsets = [0, 8], sizes = [8, 8], strides = [1, 1]} : vector<8x32xf32> to vector<8x8xf32>
    %cst_53 = arith.constant dense<0.000000e+00> : vector<8x8xf32>
    %118 = tpu.matmul %115, %116, %cst_53 {dimension_numbers = #tpu.dot_dimension_numbers<[1], [1], [0], [0], [0, 0, 1, 0], [], []>} : vector<8x8xf32>, vector<8x8xf32>, vector<8x8xf32> -> vector<8x8xf32>
    %cst_54 = arith.constant 0.353553385 : f32
    %119 = vector.broadcast %cst_54 : f32 to vector<8x8xf32>
    %120 = arith.mulf %118, %119 : vector<8x8xf32>
    %121 = arith.addf %120, %96 : vector<8x8xf32>
    %cst_55 = arith.constant dense<0xFF800000> : vector<8xf32>
    %122 = vector.multi_reduction <maximumf>, %121, %cst_55 [1] : vector<8x8xf32> to vector<8xf32>
    %123 = vector.shape_cast %122 : vector<8xf32> to vector<8x1xf32>
    %124 = vector.broadcast %123 : vector<8x1xf32> to vector<8x8xf32>
    %125 = arith.subf %121, %124 : vector<8x8xf32>
    %126 = math.exp %125 : vector<8x8xf32>
    %cst_56 = arith.constant dense<0.000000e+00> : vector<8xf32>
    %127 = vector.multi_reduction <add>, %126, %cst_56 [1] : vector<8x8xf32> to vector<8xf32>
    %128 = vector.shape_cast %127 : vector<8xf32> to vector<8x1xf32>
    %129 = tpu.reciprocal %128 {approx = true} : vector<8x1xf32> -> vector<8x1xf32>
    %130 = vector.broadcast %129 : vector<8x1xf32> to vector<8x8xf32>
    %131 = arith.mulf %126, %130 : vector<8x8xf32>
    %cst_57 = arith.constant dense<0.000000e+00> : vector<8x8xf32>
    %132 = tpu.matmul %131, %117, %cst_57 {dimension_numbers = #tpu.dot_dimension_numbers<[1], [0], [0], [1], [0, 0, 1, 1], [], []>} : vector<8x8xf32>, vector<8x8xf32>, vector<8x8xf32> -> vector<8x8xf32>
    %133 = vector.extract_strided_slice %93 {offsets = [0, 16], sizes = [8, 8], strides = [1, 1]} : vector<8x32xf32> to vector<8x8xf32>
    %134 = vector.extract_strided_slice %94 {offsets = [0, 16], sizes = [8, 8], strides = [1, 1]} : vector<8x32xf32> to vector<8x8xf32>
    %135 = vector.extract_strided_slice %95 {offsets = [0, 16], sizes = [8, 8], strides = [1, 1]} : vector<8x32xf32> to vector<8x8xf32>
    %cst_58 = arith.constant dense<0.000000e+00> : vector<8x8xf32>
    %136 = tpu.matmul %133, %134, %cst_58 {dimension_numbers = #tpu.dot_dimension_numbers<[1], [1], [0], [0], [0, 0, 1, 0], [], []>} : vector<8x8xf32>, vector<8x8xf32>, vector<8x8xf32> -> vector<8x8xf32>
    %cst_59 = arith.constant 0.353553385 : f32
    %137 = vector.broadcast %cst_59 : f32 to vector<8x8xf32>
    %138 = arith.mulf %136, %137 : vector<8x8xf32>
    %139 = arith.addf %138, %96 : vector<8x8xf32>
    %cst_60 = arith.constant dense<0xFF800000> : vector<8xf32>
    %140 = vector.multi_reduction <maximumf>, %139, %cst_60 [1] : vector<8x8xf32> to vector<8xf32>
    %141 = vector.shape_cast %140 : vector<8xf32> to vector<8x1xf32>
    %142 = vector.broadcast %141 : vector<8x1xf32> to vector<8x8xf32>
    %143 = arith.subf %139, %142 : vector<8x8xf32>
    %144 = math.exp %143 : vector<8x8xf32>
    %cst_61 = arith.constant dense<0.000000e+00> : vector<8xf32>
    %145 = vector.multi_reduction <add>, %144, %cst_61 [1] : vector<8x8xf32> to vector<8xf32>
    %146 = vector.shape_cast %145 : vector<8xf32> to vector<8x1xf32>
    %147 = tpu.reciprocal %146 {approx = true} : vector<8x1xf32> -> vector<8x1xf32>
    %148 = vector.broadcast %147 : vector<8x1xf32> to vector<8x8xf32>
    %149 = arith.mulf %144, %148 : vector<8x8xf32>
    %cst_62 = arith.constant dense<0.000000e+00> : vector<8x8xf32>
    %150 = tpu.matmul %149, %135, %cst_62 {dimension_numbers = #tpu.dot_dimension_numbers<[1], [0], [0], [1], [0, 0, 1, 1], [], []>} : vector<8x8xf32>, vector<8x8xf32>, vector<8x8xf32> -> vector<8x8xf32>
    %151 = vector.extract_strided_slice %93 {offsets = [0, 24], sizes = [8, 8], strides = [1, 1]} : vector<8x32xf32> to vector<8x8xf32>
    %152 = vector.extract_strided_slice %94 {offsets = [0, 24], sizes = [8, 8], strides = [1, 1]} : vector<8x32xf32> to vector<8x8xf32>
    %153 = vector.extract_strided_slice %95 {offsets = [0, 24], sizes = [8, 8], strides = [1, 1]} : vector<8x32xf32> to vector<8x8xf32>
    %cst_63 = arith.constant dense<0.000000e+00> : vector<8x8xf32>
    %154 = tpu.matmul %151, %152, %cst_63 {dimension_numbers = #tpu.dot_dimension_numbers<[1], [1], [0], [0], [0, 0, 1, 0], [], []>} : vector<8x8xf32>, vector<8x8xf32>, vector<8x8xf32> -> vector<8x8xf32>
    %cst_64 = arith.constant 0.353553385 : f32
    %155 = vector.broadcast %cst_64 : f32 to vector<8x8xf32>
    %156 = arith.mulf %154, %155 : vector<8x8xf32>
    %157 = arith.addf %156, %96 : vector<8x8xf32>
    %cst_65 = arith.constant dense<0xFF800000> : vector<8xf32>
    %158 = vector.multi_reduction <maximumf>, %157, %cst_65 [1] : vector<8x8xf32> to vector<8xf32>
    %159 = vector.shape_cast %158 : vector<8xf32> to vector<8x1xf32>
    %160 = vector.broadcast %159 : vector<8x1xf32> to vector<8x8xf32>
    %161 = arith.subf %157, %160 : vector<8x8xf32>
    %162 = math.exp %161 : vector<8x8xf32>
    %cst_66 = arith.constant dense<0.000000e+00> : vector<8xf32>
    %163 = vector.multi_reduction <add>, %162, %cst_66 [1] : vector<8x8xf32> to vector<8xf32>
    %164 = vector.shape_cast %163 : vector<8xf32> to vector<8x1xf32>
    %165 = tpu.reciprocal %164 {approx = true} : vector<8x1xf32> -> vector<8x1xf32>
    %166 = vector.broadcast %165 : vector<8x1xf32> to vector<8x8xf32>
    %167 = arith.mulf %162, %166 : vector<8x8xf32>
    %cst_67 = arith.constant dense<0.000000e+00> : vector<8x8xf32>
    %168 = tpu.matmul %167, %153, %cst_67 {dimension_numbers = #tpu.dot_dimension_numbers<[1], [0], [0], [1], [0, 0, 1, 1], [], []>} : vector<8x8xf32>, vector<8x8xf32>, vector<8x8xf32> -> vector<8x8xf32>
    %169 = tpu.concatenate %114, %132, %150, %168 in 1 : vector<8x8xf32>, vector<8x8xf32>, vector<8x8xf32>, vector<8x8xf32> -> vector<8x32xf32>
    %c64 = arith.constant 64 : index
    %c0_68 = arith.constant 0 : index
    %170 = vector.load %arg0[%c64, %c0_68] : memref<480x128xf32, #tpu.memory_space<vmem>>, vector<32x32xf32>
    %cst_69 = arith.constant dense<0.000000e+00> : vector<8x32xf32>
    %171 = tpu.matmul %169, %170, %cst_69 {dimension_numbers = #tpu.dot_dimension_numbers<[1], [0], [0], [1], [0, 0, 1, 1], [], []>} : vector<8x32xf32>, vector<32x32xf32>, vector<8x32xf32> -> vector<8x32xf32>
    %172 = arith.addf %65, %171 : vector<8x32xf32>
    %c230 = arith.constant 230 : index
    %c0_70 = arith.constant 0 : index
    %173 = vector.load %arg0[%c230, %c0_70] : memref<480x128xf32, #tpu.memory_space<vmem>>, vector<1x32xf32>
    %174 = vector.broadcast %173 : vector<1x32xf32> to vector<8x32xf32>
    %175 = arith.addf %172, %174 : vector<8x32xf32>
    %c231 = arith.constant 231 : index
    %c0_71 = arith.constant 0 : index
    %176 = vector.load %arg0[%c231, %c0_71] : memref<480x128xf32, #tpu.memory_space<vmem>>, vector<1x32xf32>
    %c232 = arith.constant 232 : index
    %c0_72 = arith.constant 0 : index
    %177 = vector.load %arg0[%c232, %c0_72] : memref<480x128xf32, #tpu.memory_space<vmem>>, vector<1x32xf32>
    %cst_73 = arith.constant dense<0.000000e+00> : vector<8xf32>
    %178 = vector.multi_reduction <add>, %175, %cst_73 [1] : vector<8x32xf32> to vector<8xf32>
    %179 = vector.shape_cast %178 : vector<8xf32> to vector<8x1xf32>
    %cst_74 = arith.constant 3.200000e+01 : f32
    %180 = vector.broadcast %cst_74 : f32 to vector<8x1xf32>
    %181 = arith.divf %179, %180 : vector<8x1xf32>
    %182 = vector.broadcast %181 : vector<8x1xf32> to vector<8x32xf32>
    %183 = arith.subf %175, %182 : vector<8x32xf32>
    %184 = arith.mulf %183, %183 : vector<8x32xf32>
    %cst_75 = arith.constant dense<0.000000e+00> : vector<8xf32>
    %185 = vector.multi_reduction <add>, %184, %cst_75 [1] : vector<8x32xf32> to vector<8xf32>
    %186 = vector.shape_cast %185 : vector<8xf32> to vector<8x1xf32>
    %cst_76 = arith.constant 3.200000e+01 : f32
    %187 = vector.broadcast %cst_76 : f32 to vector<8x1xf32>
    %188 = arith.divf %186, %187 : vector<8x1xf32>
    %cst_77 = arith.constant 9.99999974E-6 : f32
    %189 = vector.broadcast %cst_77 : f32 to vector<8x1xf32>
    %190 = arith.addf %188, %189 : vector<8x1xf32>
    %191 = math.rsqrt %190 : vector<8x1xf32>
    %192 = vector.broadcast %191 : vector<8x1xf32> to vector<8x32xf32>
    %193 = arith.mulf %183, %192 : vector<8x32xf32>
    %194 = vector.broadcast %176 : vector<1x32xf32> to vector<8x32xf32>
    %195 = arith.mulf %193, %194 : vector<8x32xf32>
    %196 = vector.broadcast %177 : vector<1x32xf32> to vector<8x32xf32>
    %197 = arith.addf %195, %196 : vector<8x32xf32>
    %c96 = arith.constant 96 : index
    %c0_78 = arith.constant 0 : index
    %198 = vector.load %arg0[%c96, %c0_78] : memref<480x128xf32, #tpu.memory_space<vmem>>, vector<32x64xf32>
    %cst_79 = arith.constant dense<0.000000e+00> : vector<8x64xf32>
    %199 = tpu.matmul %197, %198, %cst_79 {dimension_numbers = #tpu.dot_dimension_numbers<[1], [0], [0], [1], [0, 0, 1, 1], [], []>} : vector<8x32xf32>, vector<32x64xf32>, vector<8x64xf32> -> vector<8x64xf32>
    %c233 = arith.constant 233 : index
    %c0_80 = arith.constant 0 : index
    %200 = vector.load %arg0[%c233, %c0_80] : memref<480x128xf32, #tpu.memory_space<vmem>>, vector<1x64xf32>
    %201 = vector.broadcast %200 : vector<1x64xf32> to vector<8x64xf32>
    %202 = arith.addf %199, %201 : vector<8x64xf32>
    %cst_81 = arith.constant 0.000000e+00 : f32
    %203 = vector.broadcast %cst_81 : f32 to vector<8x64xf32>
    %204 = arith.maximumf %202, %203 : vector<8x64xf32>
    %c128 = arith.constant 128 : index
    %c0_82 = arith.constant 0 : index
    %205 = vector.load %arg0[%c128, %c0_82] : memref<480x128xf32, #tpu.memory_space<vmem>>, vector<64x32xf32>
    %cst_83 = arith.constant dense<0.000000e+00> : vector<8x32xf32>
    %206 = tpu.matmul %204, %205, %cst_83 {dimension_numbers = #tpu.dot_dimension_numbers<[1], [0], [0], [1], [0, 0, 1, 1], [], []>} : vector<8x64xf32>, vector<64x32xf32>, vector<8x32xf32> -> vector<8x32xf32>
    %207 = arith.addf %175, %206 : vector<8x32xf32>
    %c234 = arith.constant 234 : index
    %c0_84 = arith.constant 0 : index
    %208 = vector.load %arg0[%c234, %c0_84] : memref<480x128xf32, #tpu.memory_space<vmem>>, vector<1x32xf32>
    %209 = vector.broadcast %208 : vector<1x32xf32> to vector<8x32xf32>
    %210 = arith.addf %207, %209 : vector<8x32xf32>
    %c192 = arith.constant 192 : index
    %c0_85 = arith.constant 0 : index
    %211 = vector.load %arg0[%c192, %c0_85] : memref<480x128xf32, #tpu.memory_space<vmem>>, vector<32x128xf32>
    %cst_86 = arith.constant dense<0.000000e+00> : vector<8x128xf32>
    %212 = tpu.matmul %210, %211, %cst_86 {dimension_numbers = #tpu.dot_dimension_numbers<[1], [0], [0], [1], [0, 0, 1, 1], [], []>} : vector<8x32xf32>, vector<32x128xf32>, vector<8x128xf32> -> vector<8x128xf32>
    %c235 = arith.constant 235 : index
    %c0_87 = arith.constant 0 : index
    %213 = vector.load %arg0[%c235, %c0_87] : memref<480x128xf32, #tpu.memory_space<vmem>>, vector<1x128xf32>
    %214 = vector.broadcast %213 : vector<1x128xf32> to vector<8x128xf32>
    %215 = arith.addf %212, %214 : vector<8x128xf32>
    %c0_88 = arith.constant 0 : index
    %c0_89 = arith.constant 0 : index
    %216 = vector.load %arg3[%c0_88, %c0_89] : memref<8x128xf32, #tpu.memory_space<vmem>>, vector<8x128xf32>
    tpu.vector_store %arg3[%c0_88, %c0_89], %215 {strides = array<i32>} : memref<8x128xf32, #tpu.memory_space<vmem>>, vector<8x128xf32>,
    return
  }
}

</mosaic_0001>

<bundles_post_ra>
// kernel: model_forward.1
= control target key start
LH: loop header
LB: loop body
LE: loop exit
PB: predicated region body
PF: predicated region fallthrough
CT: control target
= control target key end

     0   :  { %vm74_vm0 = vcmask 1040384   ;;  %v4017_v0 = vmov 0.0   ;;  %vm4018_vm1 = vmmov 0   ;;  %vm34_vm2 = vcmask 72704   ;;  %s4020_s19 = smov 112   ;;  %s4021_s20 = smov 104   ;;  %s5245_s0 = inlined_call_operand.vmem [shape: f32[480,128], index: 0, kind: input, shape index: {}]   ;;  %s5246_s1 = inlined_call_operand.vmem [shape: f32[98,9], index: 1, kind: input, shape index: {}]   ;;  %s5247_s2 = inlined_call_operand.vmem [shape: f32[8,8], index: 2, kind: input, shape index: {}]   ;;  %s5248_s3 = inlined_call_operand.vmem [shape: f32[8,128], index: 3, kind: output, shape index: {}]  }
   0x1   :  { %3441 = vmatprep.subr.mxu0 %v4017_v0  ;;  %v15_v1 = vld [vmem:[%s5245_s0 + $0x8] sm:$0x1]  ;;  %v14_v2 = vld [vmem:[%s5245_s0] sm:$0xff]  ;;  %3445 = vmatprep.mubr.msk.f32.mxu0 %vm4018_vm1, %v4017_v0  ;;  %v18_v5 = vld [vmem:[%s5246_s1 + $0x10] sm:$0xff]  ;;  %vm262_vm3 = vcmask 1043456   ;;  %vm222_vm4 = vcmask 31744  }
   0x2   :  { %3442 = vmatpush3.msk.msra.mxu0 %vm74_vm0, %v15_v1  ;;  %v16_v3 = vld [vmem:[%s5246_s1] sm:$0xff]  ;;  %3484 = vmatprep.subr.mxu1 %v4017_v0  ;;  %v17_v4 = vld [vmem:[%s5246_s1 + $0x8] sm:$0xff]  ;;  %v19_v6 = vld [vmem:[%s5246_s1 + $0x18] sm:$0xff]  ;;  %s4022_s21 = smov 96   ;;  %vm410_vm5 = vcmask 1041408   ;;  %vm400_vm6 = vcmask 801792  }
   0x3   :  { %3443 = vmatprep.subr.mxu0 %v4017_v0  ;;  %3486 = vmatprep.mubr.msk.f32.mxu1 %vm4018_vm1, %v4017_v0  ;;  %v20_v7 = vld [vmem:[%s5246_s1 + $0x20] sm:$0xff]  ;;  %v21_v8 = vld [vmem:[%s5246_s1 + $0x28] sm:$0xff]  ;;  %v22_v9 = vld [vmem:[%s5246_s1 + $0x30] sm:$0xff]  ;;  %s4023_s24 = smov 80   ;;  %s4024_s25 = smov 88   ;;  %vm1597_vm7 = vcmask 64512  }
   0x4   :  { %3444 = vmatpush3.msra.mxu0 %v14_v2  ;;  %v23_v10 = vld [vmem:[%s5246_s1 + $0x38] sm:$0xff]  ;;  %v24_v11 = vld [vmem:[%s5246_s1 + $0x40] sm:$0xff]  ;;  %v25_v12 = vld [vmem:[%s5246_s1 + $0x48] sm:$0xff]  ;;  %s4025_s30 = smov 64   ;;  %s4026_s4 = smov 72   ;;  %vm1689_vm8 = vcmask 146432  }
   0x5   :  { %3446 = vmatmul.mubr.msk.f32.vlgmr.msra.gmra.mxu0 %vm34_vm2, %v16_v3  ;;  %3560 = vmatprep.subr.mxu0 %v4017_v0  ;;  %v26_v13 = vld [vmem:[%s5246_s1 + $0x50] sm:$0xff]  ;;  %v27_v14 = vld [vmem:[%s5246_s1 + $0x58] sm:$0xff]  ;;  %v28_v15 = vld [vmem:[%s5246_s1 + $0x60] sm:$0x3]  ;;  %s4019_s1 = smov 120   ;;  %vm1945_vm9 = vcmask 261120  }
   0x6   :  { %3448 = vmatprep.mubr.msk.f32.mxu0 %vm4018_vm1, %v4017_v0  ;;  %v221_v16 = vld [vmem:[%s5245_s0 + $0x10] sm:$0xf]  ;;  %v4152_v17 = vld [vmem:[%s5245_s0 + $0xe0] ss:$0 sm:$0xff]  ;;  %s4031_s29 = smov 16   ;;  %s4032_s5 = smov 24  }
   0x7   :  { %3485 = vmatpush3.msk.msra.mxu1 %vm262_vm3, %v221_v16  ;;  %vm2733_vm10 = vcmask 130048   ;;  %vm2735_vm11 = vcmask 195584   ;;  %vm2937_vm12 = vcmask 523264  }
   0x8   :  { %3525 = vmatprep.subr.mxu1 %v4017_v0 }
   0x9   :  { %3449 = vmatmul.mubr.msk.f32.gmra.mxu0 %vm34_vm2, %v17_v4 }
   0xa   :  { %3451 = vmatprep.mubr.msk.f32.mxu0 %vm4018_vm1, %v4017_v0 }
   0xd   :  { %3452 = vmatmul.mubr.msk.f32.gmra.mxu0 %vm34_vm2, %v18_v5 }
   0xe   :  { %3454 = vmatprep.mubr.msk.f32.mxu0 %vm4018_vm1, %v4017_v0 }
  0x11   :  { %3455 = vmatmul.mubr.msk.f32.gmra.mxu0 %vm34_vm2, %v19_v6 }
  0x12   :  { %3457 = vmatprep.mubr.msk.f32.mxu0 %vm4018_vm1, %v4017_v0 }
  0x15   :  { %3458 = vmatmul.mubr.msk.f32.gmra.mxu0 %vm34_vm2, %v20_v7 }
  0x16   :  { %3460 = vmatprep.mubr.msk.f32.mxu0 %vm4018_vm1, %v4017_v0 }
  0x19   :  { %3461 = vmatmul.mubr.msk.f32.gmra.mxu0 %vm34_vm2, %v21_v8 }
  0x1a   :  { %3463 = vmatprep.mubr.msk.f32.mxu0 %vm4018_vm1, %v4017_v0 }
  0x1d   :  { %3464 = vmatmul.mubr.msk.f32.gmra.mxu0 %vm34_vm2, %v22_v9 }
  0x1e   :  { %3466 = vmatprep.mubr.msk.f32.mxu0 %vm4018_vm1, %v4017_v0 }
  0x21   :  { %3467 = vmatmul.mubr.msk.f32.gmra.mxu0 %vm34_vm2, %v23_v10 }
  0x22   :  { %3469 = vmatprep.mubr.msk.f32.mxu0 %vm4018_vm1, %v4017_v0 }
  0x25   :  { %3470 = vmatmul.mubr.msk.f32.gmra.mxu0 %vm34_vm2, %v24_v11 }
  0x26   :  { %3472 = vmatprep.mubr.msk.f32.mxu0 %vm4018_vm1, %v4017_v0 }
  0x29   :  { %3473 = vmatmul.mubr.msk.f32.gmra.mxu0 %vm34_vm2, %v25_v12 }
  0x2a   :  { %3475 = vmatprep.mubr.msk.f32.mxu0 %vm4018_vm1, %v4017_v0 }
  0x2d   :  { %3476 = vmatmul.mubr.msk.f32.gmra.mxu0 %vm34_vm2, %v26_v13 }
  0x2e   :  { %3478 = vmatprep.mubr.msk.f32.mxu0 %vm4018_vm1, %v4017_v0 }
  0x31   :  { %3479 = vmatmul.mubr.msk.f32.gmra.mxu0 %vm34_vm2, %v27_v14 }
  0x32   :  { %3481 = vmatprep.mubr.msk.f32.mxu0 %vm4018_vm1, %v4017_v0 }
  0x35   :  { %3482 = vmatmul.mubr.msk.f32.gmra.mxu0 %vm34_vm2, %v28_v15 }
  0x36   :  { %3586 = vmatprep.mubr.msk.f32.mxu0 %vm4018_vm1, %v4017_v0 }
  0xc5   :  { %v144_v18 = vpop.f32.mrf.mxu0 }
  0xc6   :  { %v145_v19 = vadd.f32 %v4152_v17, %v144_v18 }
  0xc7   :  { %v3447_v20 = vpop.f32.mrf.mxu0 }
  0xc8   :  { %v208_v21 = vmax.f32 %v145_v19, 0.0 }
  0xc9   :  { %v149_v22 = vpop.f32.mrf.mxu0 }
  0xca   :  { %v150_v23 = vadd.f32 %v4152_v17, %v149_v22  ;;  %3487 = vmatmul.mubr.msk.f32.vlgmr.msra.gmra.mxu1 %vm222_vm4, %v208_v21 }
  0xcb   :  { %v3450_v24 = vpop.f32.mrf.mxu0  ;;  %3489 = vmatprep.mubr.msk.f32.mxu1 %vm4018_vm1, %v4017_v0 }
  0xcc   :  { %v209_v25 = vmax.f32 %v150_v23, 0.0 }
  0xcd   :  { %v154_v26 = vpop.f32.mrf.mxu0 }
  0xce   :  { %v155_v27 = vadd.f32 %v4152_v17, %v154_v26  ;;  %3490 = vmatmul.mubr.msk.f32.gmra.mxu1 %vm222_vm4, %v209_v25 }
  0xcf   :  { %v3453_v28 = vpop.f32.mrf.mxu0  ;;  %3492 = vmatprep.mubr.msk.f32.mxu1 %vm4018_vm1, %v4017_v0 }
  0xd0   :  { %v210_v29 = vmax.f32 %v155_v27, 0.0 }
  0xd1   :  { %v159_v30 = vpop.f32.mrf.mxu0 }
  0xd2   :  { %v160_v31 = vadd.f32 %v4152_v17, %v159_v30  ;;  %3493 = vmatmul.mubr.msk.f32.gmra.mxu1 %vm222_vm4, %v210_v29 }
  0xd3   :  { %v3456_v32 = vpop.f32.mrf.mxu0  ;;  %3495 = vmatprep.mubr.msk.f32.mxu1 %vm4018_vm1, %v4017_v0 }
  0xd4   :  { %v211_v33 = vmax.f32 %v160_v31, 0.0 }
  0xd5   :  { %v164_v34 = vpop.f32.mrf.mxu0 }
  0xd6   :  { %v165_v35 = vadd.f32 %v4152_v17, %v164_v34  ;;  %3496 = vmatmul.mubr.msk.f32.gmra.mxu1 %vm222_vm4, %v211_v33  ;;  %v397_v33 = vld [vmem:[%s5245_s0 + $0xf0] sm:$0xff]  ;;  %v398_v34 = vld [vmem:[%s5245_s0 + $0xf8] sm:$0xff] }
  0xd7   :  { %v3459_v36 = vpop.f32.mrf.mxu0  ;;  %3498 = vmatprep.mubr.msk.f32.mxu1 %vm4018_vm1, %v4017_v0 }
  0xd8   :  { %v212_v37 = vmax.f32 %v165_v35, 0.0  ;;  %v399_v35 = vld [vmem:[%s5245_s0 + $0x100] sm:$0x3] }
  0xd9   :  { %v169_v38 = vpop.f32.mrf.mxu0 }
  0xda   :  { %v170_v39 = vadd.f32 %v4152_v17, %v169_v38  ;;  %3499 = vmatmul.mubr.msk.f32.gmra.mxu1 %vm222_vm4, %v212_v37 }
  0xdb   :  { %v3462_v40 = vpop.f32.mrf.mxu0  ;;  %3501 = vmatprep.mubr.msk.f32.mxu1 %vm4018_vm1, %v4017_v0 }
  0xdc   :  { %v213_v41 = vmax.f32 %v170_v39, 0.0 }
  0xdd   :  { %v174_v42 = vpop.f32.mrf.mxu0 }
  0xde   :  { %v175_v43 = vadd.f32 %v4152_v17, %v174_v42  ;;  %3502 = vmatmul.mubr.msk.f32.gmra.mxu1 %vm222_vm4, %v213_v41 }
  0xdf   :  { %v3465_v44 = vpop.f32.mrf.mxu0  ;;  %3504 = vmatprep.mubr.msk.f32.mxu1 %vm4018_vm1, %v4017_v0 }
  0xe0   :  { %v214_v45 = vmax.f32 %v175_v43, 0.0 }
  0xe1   :  { %v179_v46 = vpop.f32.mrf.mxu0 }
  0xe2   :  { %v180_v47 = vadd.f32 %v4152_v17, %v179_v46  ;;  %3505 = vmatmul.mubr.msk.f32.gmra.mxu1 %vm222_vm4, %v214_v45 }
  0xe3   :  { %v3468_v48 = vpop.f32.mrf.mxu0  ;;  %3507 = vmatprep.mubr.msk.f32.mxu1 %vm4018_vm1, %v4017_v0 }
  0xe4   :  { %v215_v49 = vmax.f32 %v180_v47, 0.0 }
  0xe5   :  { %v184_v50 = vpop.f32.mrf.mxu0 }
  0xe6   :  { %v185_v51 = vadd.f32 %v4152_v17, %v184_v50  ;;  %3508 = vmatmul.mubr.msk.f32.gmra.mxu1 %vm222_vm4, %v215_v49 }
  0xe7   :  { %v3471_v52 = vpop.f32.mrf.mxu0  ;;  %3510 = vmatprep.mubr.msk.f32.mxu1 %vm4018_vm1, %v4017_v0 }
  0xe8   :  { %v216_v53 = vmax.f32 %v185_v51, 0.0 }
  0xe9   :  { %v189_v54 = vpop.f32.mrf.mxu0 }
  0xea   :  { %v190_v55 = vadd.f32 %v4152_v17, %v189_v54  ;;  %3511 = vmatmul.mubr.msk.f32.gmra.mxu1 %vm222_vm4, %v216_v53 }
  0xeb   :  { %v3474_v56 = vpop.f32.mrf.mxu0  ;;  %3513 = vmatprep.mubr.msk.f32.mxu1 %vm4018_vm1, %v4017_v0 }
  0xec   :  { %v217_v57 = vmax.f32 %v190_v55, 0.0 }
  0xed   :  { %v194_v58 = vpop.f32.mrf.mxu0 }
  0xee   :  { %v195_v59 = vadd.f32 %v4152_v17, %v194_v58  ;;  %3514 = vmatmul.mubr.msk.f32.gmra.mxu1 %vm222_vm4, %v217_v57 }
  0xef   :  { %v3477_v60 = vpop.f32.mrf.mxu0  ;;  %3516 = vmatprep.mubr.msk.f32.mxu1 %vm4018_vm1, %v4017_v0 }
  0xf0   :  { %v218_v61 = vmax.f32 %v195_v59, 0.0 }
  0xf1   :  { %v199_v62 = vpop.f32.mrf.mxu0 }
  0xf2   :  { %v200_v63 = vadd.f32 %v4152_v17, %v199_v62  ;;  %3517 = vmatmul.mubr.msk.f32.gmra.mxu1 %vm222_vm4, %v218_v61 }
  0xf3   :  { %v3480_v1 = vpop.f32.mrf.mxu0  ;;  %3519 = vmatprep.mubr.msk.f32.mxu1 %vm4018_vm1, %v4017_v0 }
  0xf4   :  { %v219_v2 = vmax.f32 %v200_v63, 0.0 }
  0xf5   :  { %v204_v3 = vpop.f32.mrf.mxu0 }
  0xf6   :  { %v205_v4 = vadd.f32 %v4152_v17, %v204_v3  ;;  %3520 = vmatmul.mubr.msk.f32.gmra.mxu1 %vm222_vm4, %v219_v2 }
  0xf7   :  { %3522 = vmatprep.mubr.msk.f32.mxu1 %vm4018_vm1, %v4017_v0  ;;  %v3483_v5 = vpop.f32.mrf.mxu0 }
  0xf8   :  { %v220_v6 = vmax.f32 %v205_v4, 0.0 }
  0xfa   :  { %3523 = vmatmul.mubr.msk.f32.gmra.mxu1 %vm222_vm4, %v220_v6 }
  0xfb   :  { %3551 = vmatprep.mubr.msk.f32.mxu1 %vm4018_vm1, %v4017_v0 }
 0x18a   :  { %v4206_v7 = vpop.f32.mrf.mxu1 }
 0x18b   :  { %516 = vrot.lane.b32.xlu1 %v4206_v7, %s4019_s1 }
 0x18c   :  { %v3488_v8 = vpop.f32.mrf.mxu1 }
 0x18e   :  { %v4210_v9 = vpop.f32.mrf.mxu1 }
 0x18f   :  { %651 = vrot.lane.b32.xlu1 %v4206_v7, %s4020_s19  ;;  %653 = vrot.lane.b32.xlu0 %v4210_v9, %s4020_s19 }
 0x190   :  { %v3491_v10 = vpop.f32.mrf.mxu1 }
 0x192   :  { %v4216_v11 = vpop.f32.mrf.mxu1 }
 0x193   :  { %786 = vrot.lane.b32.xlu1 %v4206_v7, %s4021_s20  ;;  %923 = vrot.lane.b32.xlu0 %v4210_v9, %s4022_s21 }
 0x194   :  { %v3494_v12 = vpop.f32.mrf.mxu1 }
 0x196   :  { %v4222_v13 = vpop.f32.mrf.mxu1 }
 0x197   :  { %921 = vrot.lane.b32.xlu1 %v4206_v7, %s4022_s21  ;;  %655 = vrot.lane.b32.xlu0 %v4216_v11, %s4020_s19 }
 0x198   :  { %v3497_v14 = vpop.f32.mrf.mxu1 }
 0x19a   :  { %v4228_v15 = vpop.f32.mrf.mxu1 }
 0x19b   :  { %518 = vrot.lane.b32.xlu1 %v4210_v9, %s4019_s1  ;;  %925 = vrot.lane.b32.xlu0 %v4216_v11, %s4022_s21 }
 0x19c   :  { %v3500_v16 = vpop.f32.mrf.mxu1 }
 0x19e   :  { %v4234_v17 = vpop.f32.mrf.mxu1 }
 0x19f   :  { %788 = vrot.lane.b32.xlu1 %v4210_v9, %s4021_s20  ;;  %657 = vrot.lane.b32.xlu0 %v4222_v13, %s4020_s19 }
 0x1a0   :  { %v3503_v18 = vpop.f32.mrf.mxu1 }
 0x1a2   :  { %v4240_v19 = vpop.f32.mrf.mxu1 }
 0x1a3   :  { %520 = vrot.lane.b32.xlu1 %v4216_v11, %s4019_s1  ;;  %927 = vrot.lane.b32.xlu0 %v4222_v13, %s4022_s21 }
 0x1a4   :  { %v3506_v20 = vpop.f32.mrf.mxu1 }
 0x1a6   :  { %v4246_v21 = vpop.f32.mrf.mxu1 }
 0x1a7   :  { %790 = vrot.lane.b32.xlu1 %v4216_v11, %s4021_s20  ;;  %659 = vrot.lane.b32.xlu0 %v4228_v15, %s4020_s19 }
 0x1a8   :  { %v3509_v22 = vpop.f32.mrf.mxu1 }
 0x1aa   :  { %v4252_v23 = vpop.f32.mrf.mxu1 }
 0x1ab   :  { %522 = vrot.lane.b32.xlu1 %v4222_v13, %s4019_s1  ;;  %929 = vrot.lane.b32.xlu0 %v4228_v15, %s4022_s21 }
 0x1ac   :  { %v3512_v24 = vpop.f32.mrf.mxu1 }
 0x1ae   :  { %v4258_v25 = vpop.f32.mrf.mxu1 }
 0x1af   :  { %792 = vrot.lane.b32.xlu1 %v4222_v13, %s4021_s20  ;;  %661 = vrot.lane.b32.xlu0 %v4234_v17, %s4020_s19 }
 0x1b0   :  { %v3515_v26 = vpop.f32.mrf.mxu1 }
 0x1b2   :  { %v4264_v27 = vpop.f32.mrf.mxu1 }
 0x1b3   :  { %524 = vrot.lane.b32.xlu1 %v4228_v15, %s4019_s1  ;;  %931 = vrot.lane.b32.xlu0 %v4234_v17, %s4022_s21 }
 0x1b4   :  { %v3518_v28 = vpop.f32.mrf.mxu1 }
 0x1b6   :  { %v4270_v29 = vpop.f32.mrf.mxu1 }
 0x1b7   :  { %794 = vrot.lane.b32.xlu1 %v4228_v15, %s4021_s20  ;;  %663 = vrot.lane.b32.xlu0 %v4240_v19, %s4020_s19 }
 0x1b8   :  { %v3521_v30 = vpop.f32.mrf.mxu1 }
 0x1ba   :  { %v4276_v31 = vpop.f32.mrf.mxu1 }
 0x1bb   :  { %526 = vrot.lane.b32.xlu1 %v4234_v17, %s4019_s1  ;;  %933 = vrot.lane.b32.xlu0 %v4240_v19, %s4022_s21 }
 0x1bc   :  { %3526 = vmatpush3.msk.msra.mxu1 %vm410_vm5, %v4276_v31  ;;  %v3524_v32 = vpop.f32.mrf.mxu1 }
 0x1bd   :  { %3527 = vmatprep.subr.mxu1 %v4017_v0 }
 0x1be   :  { %3528 = vmatpush3.msra.mxu1 %v4270_v29 }
 0x1bf   :  { %3529 = vmatprep.subr.mxu1 %v4017_v0  ;;  %796 = vrot.lane.b32.xlu1 %v4234_v17, %s4021_s20 }
 0x1c0   :  { %665 = vrot.lane.b32.xlu0 %v4246_v21, %s4020_s19  ;;  %3530 = vmatpush3.msra.mxu1 %v4264_v27 }
 0x1c1   :  { %3531 = vmatprep.subr.mxu1 %v4017_v0 }
 0x1c2   :  { %3532 = vmatpush3.msra.mxu1 %v4258_v25 }
 0x1c3   :  { %3533 = vmatprep.subr.mxu1 %v4017_v0  ;;  %528 = vrot.lane.b32.xlu1 %v4240_v19, %s4019_s1 }
 0x1c4   :  { %935 = vrot.lane.b32.xlu0 %v4246_v21, %s4022_s21  ;;  %3534 = vmatpush3.msra.mxu1 %v4252_v23 }
 0x1c5   :  { %3535 = vmatprep.subr.mxu1 %v4017_v0 }
 0x1c6   :  { %3536 = vmatpush3.msra.mxu1 %v4246_v21 }
 0x1c7   :  { %3537 = vmatprep.subr.mxu1 %v4017_v0  ;;  %798 = vrot.lane.b32.xlu1 %v4240_v19, %s4021_s20 }
 0x1c8   :  { %667 = vrot.lane.b32.xlu0 %v4252_v23, %s4020_s19  ;;  %3538 = vmatpush3.msra.mxu1 %v4240_v19 }
 0x1c9   :  { %3539 = vmatprep.subr.mxu1 %v4017_v0 }
 0x1ca   :  { %3540 = vmatpush3.msra.mxu1 %v4234_v17 }
 0x1cb   :  { %3541 = vmatprep.subr.mxu1 %v4017_v0  ;;  %530 = vrot.lane.b32.xlu1 %v4246_v21, %s4019_s1 }
 0x1cc   :  { %937 = vrot.lane.b32.xlu0 %v4252_v23, %s4022_s21  ;;  %3542 = vmatpush3.msra.mxu1 %v4228_v15 }
 0x1cd   :  { %3543 = vmatprep.subr.mxu1 %v4017_v0 }
 0x1ce   :  { %3544 = vmatpush3.msra.mxu1 %v4222_v13 }
 0x1cf   :  { %3545 = vmatprep.subr.mxu1 %v4017_v0  ;;  %800 = vrot.lane.b32.xlu1 %v4246_v21, %s4021_s20 }
 0x1d0   :  { %669 = vrot.lane.b32.xlu0 %v4258_v25, %s4020_s19  ;;  %3546 = vmatpush3.msra.mxu1 %v4216_v11 }
 0x1d1   :  { %3547 = vmatprep.subr.mxu1 %v4017_v0 }
 0x1d2   :  { %3548 = vmatpush3.msra.mxu1 %v4210_v9 }
 0x1d3   :  { %3549 = vmatprep.subr.mxu1 %v4017_v0  ;;  %532 = vrot.lane.b32.xlu1 %v4252_v23, %s4019_s1 }
 0x1d4   :  { %939 = vrot.lane.b32.xlu0 %v4258_v25, %s4022_s21  ;;  %3550 = vmatpush3.msra.mxu1 %v4206_v7 }
 0x1d5   :  { %3595 = vmatprep.subr.mxu1 %v4017_v0  ;;  %3552 = vmatmul.mubr.msk.f32.vlgmr.msra.gmra.mxu1 %vm400_vm6, %v397_v33  ;;  %v501_v33 = vld [vmem:[%s5245_s0 + $0x108] sm:$0xff] }
 0x1d6   :  { %3554 = vmatprep.mubr.msk.f32.mxu1 %vm4018_vm1, %v4017_v0 }
 0x1d7   :  { %802 = vrot.lane.b32.xlu1 %v4252_v23, %s4021_s20 }
 0x1d8   :  { %671 = vrot.lane.b32.xlu0 %v4264_v27, %s4020_s19 }
 0x1d9   :  { %3555 = vmatmul.mubr.msk.f32.gmra.mxu1 %vm400_vm6, %v398_v34 }
 0x1da   :  { %3557 = vmatprep.mubr.msk.f32.mxu1 %vm4018_vm1, %v4017_v0 }
 0x1db   :  { %534 = vrot.lane.b32.xlu1 %v4258_v25, %s4019_s1 }
 0x1dc   :  { %941 = vrot.lane.b32.xlu0 %v4264_v27, %s4022_s21 }
 0x1dd   :  { %3558 = vmatmul.mubr.msk.f32.gmra.mxu1 %vm400_vm6, %v399_v35  ;;  %v648_v35 = vld [vmem:[%s5245_s0 + $0x120] sm:$0xff] }
 0x1de   :  { %3621 = vmatprep.mubr.msk.f32.mxu1 %vm4018_vm1, %v4017_v0 }
 0x1df   :  { %804 = vrot.lane.b32.xlu1 %v4258_v25, %s4021_s20 }
 0x1e0   :  { %538 = vrot.lane.b32.xlu0 %v4270_v29, %s4019_s1 }
 0x1e3   :  { %536 = vrot.lane.b32.xlu1 %v4264_v27, %s4019_s1 }
 0x1e4   :  { %673 = vrot.lane.b32.xlu0 %v4270_v29, %s4020_s19 }
 0x1e7   :  { %806 = vrot.lane.b32.xlu1 %v4264_v27, %s4021_s20 }
 0x1e8   :  { %943 = vrot.lane.b32.xlu0 %v4270_v29, %s4022_s21 }
 0x1eb   :  { %808 = vrot.lane.b32.xlu1 %v4270_v29, %s4021_s20 }
 0x1ec   :  { %540 = vrot.lane.b32.xlu0 %v4276_v31, %s4019_s1 }
 0x1ef   :  { %675 = vrot.lane.b32.xlu1 %v4276_v31, %s4020_s19 }
 0x1f0   :  { %1213 = vrot.lane.b32.xlu0 %v4270_v29, %s4023_s24 }
 0x1f3   :  { %1078 = vrot.lane.b32.xlu1 %v4270_v29, %s4024_s25 }
 0x1f4   :  { %1211 = vrot.lane.b32.xlu0 %v4264_v27, %s4023_s24 }
 0x1f7   :  { %1076 = vrot.lane.b32.xlu1 %v4264_v27, %s4024_s25 }
 0x1f8   :  { %1209 = vrot.lane.b32.xlu0 %v4258_v25, %s4023_s24 }
 0x1fb   :  { %1074 = vrot.lane.b32.xlu1 %v4258_v25, %s4024_s25 }
 0x1fc   :  { %1207 = vrot.lane.b32.xlu0 %v4252_v23, %s4023_s24 }
 0x1fd   :  { %v4391_v36 = vpop.permute.xlu1 %516 }
 0x1ff   :  { %1072 = vrot.lane.b32.xlu1 %v4252_v23, %s4024_s25 }
 0x200   :  { %1205 = vrot.lane.b32.xlu0 %v4246_v21, %s4023_s24 }
 0x201   :  { %v4397_v37 = vpop.permute.xlu1 %651  ;;  %v4399_v38 = vpop.permute.xlu0 %653 }
 0x203   :  { %1070 = vrot.lane.b32.xlu1 %v4246_v21, %s4024_s25 }
 0x204   :  { %1203 = vrot.lane.b32.xlu0 %v4240_v19, %s4023_s24 }
 0x205   :  { %v4405_v39 = vpop.permute.xlu1 %786  ;;  %v4407_v40 = vpop.permute.xlu0 %923 }
 0x207   :  { %1068 = vrot.lane.b32.xlu1 %v4240_v19, %s4024_s25 }
 0x208   :  { %1201 = vrot.lane.b32.xlu0 %v4234_v17, %s4023_s24 }
 0x209   :  { %v4413_v41 = vpop.permute.xlu1 %921  ;;  %v4415_v42 = vpop.permute.xlu0 %655 }
 0x20b   :  { %1066 = vrot.lane.b32.xlu1 %v4234_v17, %s4024_s25 }
 0x20c   :  { %810 = vrot.lane.b32.xlu0 %v4276_v31, %s4021_s20 }
 0x20d   :  { %v4421_v43 = vpop.permute.xlu1 %518  ;;  %v4423_v44 = vpop.permute.xlu0 %925 }
 0x20f   :  { %1064 = vrot.lane.b32.xlu1 %v4228_v15, %s4024_s25 }
 0x210   :  { %945 = vrot.lane.b32.xlu0 %v4276_v31, %s4022_s21 }
 0x211   :  { %v4429_v45 = vpop.permute.xlu1 %788  ;;  %v4431_v46 = vpop.permute.xlu0 %657 }
 0x213   :  { %1062 = vrot.lane.b32.xlu1 %v4222_v13, %s4024_s25 }
 0x214   :  { %1199 = vrot.lane.b32.xlu0 %v4228_v15, %s4023_s24 }
 0x215   :  { %v4437_v47 = vpop.permute.xlu1 %520  ;;  %v4439_v48 = vpop.permute.xlu0 %927 }
 0x217   :  { %1060 = vrot.lane.b32.xlu1 %v4216_v11, %s4024_s25 }
 0x218   :  { %1197 = vrot.lane.b32.xlu0 %v4222_v13, %s4023_s24 }
 0x219   :  { %v4445_v49 = vpop.permute.xlu1 %790  ;;  %v4447_v50 = vpop.permute.xlu0 %659 }
 0x21b   :  { %1058 = vrot.lane.b32.xlu1 %v4210_v9, %s4024_s25 }
 0x21c   :  { %1195 = vrot.lane.b32.xlu0 %v4216_v11, %s4023_s24 }
 0x21d   :  { %v4453_v51 = vpop.permute.xlu1 %522  ;;  %v4455_v52 = vpop.permute.xlu0 %929 }
 0x21f   :  { %1056 = vrot.lane.b32.xlu1 %v4206_v7, %s4024_s25 }
 0x220   :  { %1193 = vrot.lane.b32.xlu0 %v4210_v9, %s4023_s24 }
 0x221   :  { %v4461_v53 = vpop.permute.xlu1 %792  ;;  %v4463_v54 = vpop.permute.xlu0 %661 }
 0x223   :  { %1191 = vrot.lane.b32.xlu1 %v4206_v7, %s4023_s24 }
 0x224   :  { %1483 = vrot.lane.b32.xlu0 %v4270_v29, %s4025_s30 }
 0x225   :  { %v4469_v55 = vpop.permute.xlu1 %524  ;;  %v4471_v56 = vpop.permute.xlu0 %931 }
 0x227   :  { %1348 = vrot.lane.b32.xlu1 %v4270_v29, %s4026_s4 }
 0x228   :  { %1080 = vrot.lane.b32.xlu0 %v4276_v31, %s4024_s25 }
 0x229   :  { %v4477_v57 = vpop.permute.xlu1 %794  ;;  %v4479_v58 = vpop.permute.xlu0 %663 }
 0x22b   :  { %1346 = vrot.lane.b32.xlu1 %v4264_v27, %s4026_s4 }
 0x22c   :  { %1215 = vrot.lane.b32.xlu0 %v4276_v31, %s4023_s24 }
 0x22d   :  { %v4485_v59 = vpop.permute.xlu1 %526  ;;  %v4487_v60 = vpop.permute.xlu0 %933 }
 0x22f   :  { %1344 = vrot.lane.b32.xlu1 %v4258_v25, %s4026_s4 }
 0x230   :  { %1481 = vrot.lane.b32.xlu0 %v4264_v27, %s4025_s30 }
 0x231   :  { %v4493_v61 = vpop.permute.xlu1 %796 }
 0x232   :  { %v4495_v62 = vpop.permute.xlu0 %665 }
 0x233   :  { %1342 = vrot.lane.b32.xlu1 %v4252_v23, %s4026_s4 }
 0x234   :  { %1479 = vrot.lane.b32.xlu0 %v4258_v25, %s4025_s30 }
 0x235   :  { %v4501_v63 = vpop.permute.xlu1 %528 }
 0x236   :  { %v4503_v1 = vpop.permute.xlu0 %935 }
 0x237   :  { %1340 = vrot.lane.b32.xlu1 %v4246_v21, %s4026_s4 }
 0x238   :  { %1477 = vrot.lane.b32.xlu0 %v4252_v23, %s4025_s30 }
 0x239   :  { %v4509_v2 = vpop.permute.xlu1 %798 }
 0x23a   :  { %v668_v3 = vpop.permute.xlu0 %667 }
 0x23b   :  { %1338 = vrot.lane.b32.xlu1 %v4240_v19, %s4026_s4 }
 0x23c   :  { %1475 = vrot.lane.b32.xlu0 %v4246_v21, %s4025_s30 }
 0x23d   :  { %v531_v4 = vpop.permute.xlu1 %530 }
 0x23e   :  { %v4515_v5 = vpop.permute.xlu0 %937 }
 0x23f   :  { %1336 = vrot.lane.b32.xlu1 %v4234_v17, %s4026_s4 }
 0x240   :  { %1350 = vrot.lane.b32.xlu0 %v4276_v31, %s4026_s4 }
 0x241   :  { %v4521_v6 = vpop.permute.xlu1 %800 }
 0x242   :  { %v670_v8 = vpop.permute.xlu0 %669 }
 0x243   :  { %1334 = vrot.lane.b32.xlu1 %v4228_v15, %s4026_s4 }
 0x244   :  { %1485 = vrot.lane.b32.xlu0 %v4276_v31, %s4025_s30 }
 0x245   :  { %v533_v10 = vpop.permute.xlu1 %532 }
 0x246   :  { %v4527_v12 = vpop.permute.xlu0 %939 }
 0x247   :  { %1332 = vrot.lane.b32.xlu1 %v4222_v13, %s4026_s4 }
 0x248   :  { %1473 = vrot.lane.b32.xlu0 %v4240_v19, %s4025_s30 }
 0x249   :  { %v4533_v14 = vpop.permute.xlu1 %802 }
 0x24a   :  { %v672_v16 = vpop.permute.xlu0 %671 }
 0x24b   :  { %1330 = vrot.lane.b32.xlu1 %v4216_v11, %s4026_s4 }
 0x24c   :  { %1471 = vrot.lane.b32.xlu0 %v4234_v17, %s4025_s30 }
 0x24d   :  { %v535_v18 = vpop.permute.xlu1 %534 }
 0x24e   :  { %v4539_v20 = vpop.permute.xlu0 %941 }
 0x24f   :  { %1328 = vrot.lane.b32.xlu1 %v4210_v9, %s4026_s4 }
 0x250   :  { %1469 = vrot.lane.b32.xlu0 %v4228_v15, %s4025_s30 }
 0x251   :  { %v4545_v21 = vpop.permute.xlu1 %804 }
 0x252   :  { %v539_v19 = vpop.permute.xlu0 %538 }
 0x253   :  { %1326 = vrot.lane.b32.xlu1 %v4206_v7, %s4026_s4 }
 0x254   :  { %1467 = vrot.lane.b32.xlu0 %v4222_v13, %s4025_s30 }
 0x255   :  { %v537_v22 = vpop.permute.xlu1 %536 }
 0x256   :  { %v674_v17 = vpop.permute.xlu0 %673 }
 0x257   :  { %1461 = vrot.lane.b32.xlu1 %v4206_v7, %s4025_s30 }
 0x258   :  { %1465 = vrot.lane.b32.xlu0 %v4216_v11, %s4025_s30 }
 0x259   :  { %v4555_v23 = vpop.permute.xlu1 %806 }
 0x25a   :  { %v4557_v15 = vpop.permute.xlu0 %943 }
 0x25c   :  { %1463 = vrot.lane.b32.xlu0 %v4210_v9, %s4025_s30 }
 0x25d   :  { %v4561_v24 = vpop.permute.xlu1 %808 }
 0x25e   :  { %v541_v25 = vpop.permute.xlu0 %540 }
 0x25f   :  { %3561 = vmatpush3.msk.msra.mxu0 %vm410_vm5, %v541_v25 }
 0x260   :  { %3562 = vmatprep.subr.mxu0 %v4017_v0 }
 0x261   :  { %3563 = vmatpush3.msra.mxu0 %v539_v19  ;;  %v676_v13 = vpop.permute.xlu1 %675  ;;  %v1053_v19 = vld [vmem:[%s5245_s0 + $0x168] sm:$0xff] }
 0x262   :  { %3564 = vmatprep.subr.mxu0 %v4017_v0  ;;  %v4566_v7 = vpop.permute.xlu0 %1213  ;;  %3596 = vmatpush3.msk.msra.mxu1 %vm410_vm5, %v676_v13  ;;  %v1054_v13 = vld [vmem:[%s5245_s0 + $0x170] sm:$0xff] }
 0x263   :  { %3565 = vmatpush3.msra.mxu0 %v537_v22  ;;  %3597 = vmatprep.subr.mxu1 %v4017_v0 }
 0x264   :  { %3566 = vmatprep.subr.mxu0 %v4017_v0  ;;  %3598 = vmatpush3.msra.mxu1 %v674_v17 }
 0x265   :  { %3567 = vmatpush3.msra.mxu0 %v535_v18  ;;  %v4571_v9 = vpop.permute.xlu1 %1078  ;;  %3599 = vmatprep.subr.mxu1 %v4017_v0 }
 0x266   :  { %3568 = vmatprep.subr.mxu0 %v4017_v0  ;;  %v4575_v11 = vpop.permute.xlu0 %1211  ;;  %3600 = vmatpush3.msra.mxu1 %v672_v16 }
 0x267   :  { %3569 = vmatpush3.msra.mxu0 %v533_v10  ;;  %3601 = vmatprep.subr.mxu1 %v4017_v0 }
 0x268   :  { %3570 = vmatprep.subr.mxu0 %v4017_v0  ;;  %3602 = vmatpush3.msra.mxu1 %v670_v8 }
 0x269   :  { %3571 = vmatpush3.msra.mxu0 %v531_v4  ;;  %v4579_v26 = vpop.permute.xlu1 %1076  ;;  %3603 = vmatprep.subr.mxu1 %v4017_v0 }
 0x26a   :  { %3572 = vmatprep.subr.mxu0 %v4017_v0  ;;  %v4583_v27 = vpop.permute.xlu0 %1209  ;;  %3604 = vmatpush3.msra.mxu1 %v668_v3 }
 0x26b   :  { %3573 = vmatpush3.msra.mxu0 %v4501_v63  ;;  %3605 = vmatprep.subr.mxu1 %v4017_v0 }
 0x26c   :  { %3574 = vmatprep.subr.mxu0 %v4017_v0  ;;  %3606 = vmatpush3.msra.mxu1 %v4495_v62 }
 0x26d   :  { %3575 = vmatpush3.msra.mxu0 %v4485_v59  ;;  %v4590_v28 = vpop.permute.xlu1 %1074  ;;  %3607 = vmatprep.subr.mxu1 %v4017_v0 }
 0x26e   :  { %3576 = vmatprep.subr.mxu0 %v4017_v0  ;;  %v4594_v29 = vpop.permute.xlu0 %1207  ;;  %3608 = vmatpush3.msra.mxu1 %v4479_v58 }
 0x26f   :  { %3577 = vmatpush3.msra.mxu0 %v4469_v55  ;;  %3609 = vmatprep.subr.mxu1 %v4017_v0 }
 0x270   :  { %3578 = vmatprep.subr.mxu0 %v4017_v0  ;;  %3610 = vmatpush3.msra.mxu1 %v4463_v54 }
 0x271   :  { %3579 = vmatpush3.msra.mxu0 %v4453_v51  ;;  %v4602_v30 = vpop.permute.xlu1 %1072  ;;  %3611 = vmatprep.subr.mxu1 %v4017_v0 }
 0x272   :  { %3580 = vmatprep.subr.mxu0 %v4017_v0  ;;  %v4606_v31 = vpop.permute.xlu0 %1205  ;;  %3612 = vmatpush3.msra.mxu1 %v4447_v50 }
 0x273   :  { %3581 = vmatpush3.msra.mxu0 %v4437_v47  ;;  %3613 = vmatprep.subr.mxu1 %v4017_v0 }
 0x274   :  { %3582 = vmatprep.subr.mxu0 %v4017_v0  ;;  %3614 = vmatpush3.msra.mxu1 %v4431_v46 }
 0x275   :  { %3583 = vmatpush3.msra.mxu0 %v4421_v43  ;;  %v4614_v32 = vpop.permute.xlu1 %1070  ;;  %3615 = vmatprep.subr.mxu1 %v4017_v0 }
 0x276   :  { %3584 = vmatprep.subr.mxu0 %v4017_v0  ;;  %v4621_v34 = vpop.permute.xlu0 %1203  ;;  %3616 = vmatpush3.msra.mxu1 %v4415_v42 }
 0x277   :  { %3585 = vmatpush3.msra.mxu0 %v4391_v36  ;;  %3617 = vmatprep.subr.mxu1 %v4017_v0  ;;  %v502_v36 = vld [vmem:[%s5245_s0 + $0x110] sm:$0xff] }
 0x278   :  { %3618 = vmatpush3.msra.mxu1 %v4399_v38  ;;  %3587 = vmatmul.mubr.msk.f32.vlgmr.msra.gmra.mxu0 %vm400_vm6, %v501_v33  ;;  %v649_v38 = vld [vmem:[%s5245_s0 + $0x128] sm:$0xff] }
 0x279   :  { %v4631_v43 = vpop.permute.xlu1 %1068  ;;  %3619 = vmatprep.subr.mxu1 %v4017_v0  ;;  %3630 = vmatprep.subr.mxu0 %v4017_v0 }
 0x27a   :  { %v4638_v42 = vpop.permute.xlu0 %1201  ;;  %3620 = vmatpush3.msra.mxu1 %v4397_v37  ;;  %3589 = vmatprep.mubr.msk.f32.mxu0 %vm4018_vm1, %v4017_v0  ;;  %v503_v37 = vld [vmem:[%s5245_s0 + $0x118] sm:$0x3] }
 0x27b   :  { %3622 = vmatmul.mubr.msk.f32.vlgmr.msra.gmra.mxu1 %vm400_vm6, %v648_v35  ;;  %3665 = vmatprep.subr.mxu1 %v4017_v0 }
 0x27c   :  { %3590 = vmatmul.mubr.msk.f32.gmra.mxu0 %vm400_vm6, %v502_v36  ;;  %3624 = vmatprep.mubr.msk.f32.mxu1 %vm4018_vm1, %v4017_v0 }
 0x27d   :  { %v4651_v46 = vpop.permute.xlu1 %1066  ;;  %3592 = vmatprep.mubr.msk.f32.mxu0 %vm4018_vm1, %v4017_v0 }
 0x27e   :  { %v811_v47 = vpop.permute.xlu0 %810 }
 0x27f   :  { %3631 = vmatpush3.msk.msra.mxu0 %vm410_vm5, %v811_v47  ;;  %3625 = vmatmul.mubr.msk.f32.gmra.mxu1 %vm400_vm6, %v649_v38  ;;  %v1458_v38 = vld [vmem:[%s5245_s0 + $0x1b0] sm:$0xff]  ;;  %v1459_v47 = vld [vmem:[%s5245_s0 + $0x1b8] sm:$0xff] }
 0x280   :  { %3632 = vmatprep.subr.mxu0 %v4017_v0  ;;  %3593 = vmatmul.mubr.msk.f32.gmra.mxu0 %vm400_vm6, %v503_v37  ;;  %v1325_v37 = vld [vmem:[%s5245_s0 + $0x1a8] sm:$0x3] }
 0x281   :  { %3633 = vmatpush3.msra.mxu0 %v4561_v24  ;;  %v4663_v50 = vpop.permute.xlu1 %1064  ;;  %3627 = vmatprep.mubr.msk.f32.mxu1 %vm4018_vm1, %v4017_v0 }
 0x282   :  { %3634 = vmatprep.subr.mxu0 %v4017_v0  ;;  %v946_v51 = vpop.permute.xlu0 %945  ;;  %3656 = vmatprep.mubr.msk.f32.mxu0 %vm4018_vm1, %v4017_v0 }
 0x283   :  { %3635 = vmatpush3.msra.mxu0 %v4555_v23  ;;  %3666 = vmatpush3.msk.msra.mxu1 %vm410_vm5, %v946_v51  ;;  %v1596_v51 = vld [vmem:[%s5245_s0 + $0x18] sm:$0xff] }
 0x284   :  { %3636 = vmatprep.subr.mxu0 %v4017_v0  ;;  %3667 = vmatprep.subr.mxu1 %v4017_v0 }
 0x285   :  { %3637 = vmatpush3.msra.mxu0 %v4545_v21  ;;  %3668 = vmatpush3.msra.mxu1 %v4557_v15  ;;  %v4676_v54 = vpop.permute.xlu1 %1062 }
 0x286   :  { %3638 = vmatprep.subr.mxu0 %v4017_v0  ;;  %v4679_v55 = vpop.permute.xlu0 %1199  ;;  %3669 = vmatprep.subr.mxu1 %v4017_v0 }
 0x287   :  { %3639 = vmatpush3.msra.mxu0 %v4533_v14  ;;  %3670 = vmatpush3.msra.mxu1 %v4539_v20 }
 0x288   :  { %3640 = vmatprep.subr.mxu0 %v4017_v0  ;;  %3671 = vmatprep.subr.mxu1 %v4017_v0 }
 0x289   :  { %3641 = vmatpush3.msra.mxu0 %v4521_v6  ;;  %3672 = vmatpush3.msra.mxu1 %v4527_v12  ;;  %v4688_v58 = vpop.permute.xlu1 %1060 }
 0x28a   :  { %3642 = vmatprep.subr.mxu0 %v4017_v0  ;;  %v4691_v59 = vpop.permute.xlu0 %1197  ;;  %3673 = vmatprep.subr.mxu1 %v4017_v0 }
 0x28b   :  { %3643 = vmatpush3.msra.mxu0 %v4509_v2  ;;  %3674 = vmatpush3.msra.mxu1 %v4515_v5  ;;  %v920_v5 = vld [vmem:[%s5245_s0 + $0x160] sm:$0x3] }
 0x28c   :  { %3644 = vmatprep.subr.mxu0 %v4017_v0  ;;  %3675 = vmatprep.subr.mxu1 %v4017_v0 }
 0x28d   :  { %3645 = vmatpush3.msra.mxu0 %v4493_v61  ;;  %3676 = vmatpush3.msra.mxu1 %v4503_v1  ;;  %v4700_v62 = vpop.permute.xlu1 %1058  ;;  %v650_v1 = vld [vmem:[%s5245_s0 + $0x130] sm:$0x3] }
 0x28e   :  { %3646 = vmatprep.subr.mxu0 %v4017_v0  ;;  %v4703_v63 = vpop.permute.xlu0 %1195  ;;  %3677 = vmatprep.subr.mxu1 %v4017_v0 }
 0x28f   :  { %3647 = vmatpush3.msra.mxu0 %v4477_v57  ;;  %3678 = vmatpush3.msra.mxu1 %v4487_v60  ;;  %v919_v57 = vld [vmem:[%s5245_s0 + $0x158] sm:$0xff] }
 0x290   :  { %3648 = vmatprep.subr.mxu0 %v4017_v0  ;;  %3679 = vmatprep.subr.mxu1 %v4017_v0 }
 0x291   :  { %3649 = vmatpush3.msra.mxu0 %v4461_v53  ;;  %3680 = vmatpush3.msra.mxu1 %v4471_v56  ;;  %v4712_v61 = vpop.permute.xlu1 %1056  ;;  %v783_v56 = vld [vmem:[%s5245_s0 + $0x138] sm:$0xff] }
 0x292   :  { %3650 = vmatprep.subr.mxu0 %v4017_v0  ;;  %v4718_v2 = vpop.permute.xlu0 %1193  ;;  %3681 = vmatprep.subr.mxu1 %v4017_v0 }
 0x293   :  { %3651 = vmatpush3.msra.mxu0 %v4445_v49  ;;  %3682 = vmatpush3.msra.mxu1 %v4455_v52 }
 0x294   :  { %3628 = vmatmul.mubr.msk.f32.gmra.mxu1 %vm400_vm6, %v650_v1  ;;  %3652 = vmatprep.subr.mxu0 %v4017_v0 }
 0x295   :  { %3683 = vmatprep.subr.mxu1 %v4017_v0  ;;  %3653 = vmatpush3.msra.mxu0 %v4429_v45  ;;  %v4727_v53 = vpop.permute.xlu1 %1191  ;;  %v4786_v4 = vpop.f32.mrf.mxu1 }
 0x296   :  { %3684 = vmatpush3.msra.mxu1 %v4439_v48  ;;  %3654 = vmatprep.subr.mxu0 %v4017_v0  ;;  %v4734_v49 = vpop.permute.xlu0 %1483 }
 0x297   :  { %3685 = vmatprep.subr.mxu1 %v4017_v0  ;;  %3655 = vmatpush3.msra.mxu0 %v4405_v39  ;;  %v784_v39 = vld [vmem:[%s5245_s0 + $0x140] sm:$0xff]  ;;  %v3553_v8 = vpop.f32.mrf.mxu1 }
 0x298   :  { %3686 = vmatpush3.msra.mxu1 %v4423_v44  ;;  %3657 = vmatmul.mubr.msk.f32.vlgmr.msra.gmra.mxu0 %vm400_vm6, %v783_v56  ;;  %v918_v44 = vld [vmem:[%s5245_s0 + $0x150] sm:$0xff] }
 0x299   :  { %3687 = vmatprep.subr.mxu1 %v4017_v0  ;;  %v4741_v45 = vpop.permute.xlu1 %1348  ;;  %3700 = vmatprep.subr.mxu0 %v4017_v0  ;;  %v4838_v21 = vpop.f32.mrf.mxu1 }
 0x29a   :  { %3688 = vmatpush3.msra.mxu1 %v4407_v40  ;;  %v1081_v48 = vpop.permute.xlu0 %1080  ;;  %3659 = vmatprep.mubr.msk.f32.mxu0 %vm4018_vm1, %v4017_v0 }
 0x29b   :  { %3689 = vmatprep.subr.mxu1 %v4017_v0  ;;  %3691 = vmatprep.mubr.msk.f32.mxu1 %vm4018_vm1, %v4017_v0  ;;  %v3556_v17 = vpop.f32.mrf.mxu1 }
 0x29c   :  { %3690 = vmatpush3.msra.mxu1 %v4413_v41  ;;  %3701 = vmatpush3.msk.msra.mxu0 %vm410_vm5, %v1081_v48  ;;  %v785_v41 = vld [vmem:[%s5245_s0 + $0x148] sm:$0x3] }
 0x29d   :  { %3660 = vmatmul.mubr.msk.f32.gmra.mxu0 %vm400_vm6, %v784_v39  ;;  %3692 = vmatmul.mubr.msk.f32.vlgmr.msra.gmra.mxu1 %vm400_vm6, %v918_v44  ;;  %v4760_v40 = vpop.permute.xlu1 %1346  ;;  %v4852_v15 = vpop.f32.mrf.mxu1 }
 0x29e   :  { %3702 = vmatprep.subr.mxu0 %v4017_v0  ;;  %v1216_v52 = vpop.permute.xlu0 %1215  ;;  %3735 = vmatprep.subr.mxu1 %v4017_v0 }
 0x29f   :  { %3703 = vmatpush3.msra.mxu0 %v4571_v9  ;;  %3662 = vmatprep.mubr.msk.f32.mxu0 %vm4018_vm1, %v4017_v0  ;;  %v3559_v25 = vpop.f32.mrf.mxu1 }
 0x2a0   :  { %3704 = vmatprep.subr.mxu0 %v4017_v0  ;;  %3694 = vmatprep.mubr.msk.f32.mxu1 %vm4018_vm1, %v4017_v0 }
 0x2a1   :  { %3705 = vmatpush3.msra.mxu0 %v4579_v26  ;;  %3736 = vmatpush3.msk.msra.mxu1 %vm410_vm5, %v1216_v52  ;;  %v4778_v60 = vpop.permute.xlu1 %1344  ;;  %v1055_v26 = vld [vmem:[%s5245_s0 + $0x178] sm:$0x3] }
 0x2a2   :  { %3663 = vmatmul.mubr.msk.f32.gmra.mxu0 %vm400_vm6, %v785_v41  ;;  %3695 = vmatmul.mubr.msk.f32.gmra.mxu1 %vm400_vm6, %v919_v57  ;;  %v4782_v3 = vpop.permute.xlu0 %1481 }
 0x2a3   :  { %3706 = vmatprep.subr.mxu0 %v4017_v0  ;;  %3737 = vmatprep.subr.mxu1 %v4017_v0 }
 0x2a4   :  { %3707 = vmatpush3.msra.mxu0 %v4590_v28  ;;  %3738 = vmatpush3.msra.mxu1 %v4566_v7  ;;  %v1188_v7 = vld [vmem:[%s5245_s0 + $0x180] sm:$0xff] }
 0x2a5   :  { %3708 = vmatprep.subr.mxu0 %v4017_v0  ;;  %3739 = vmatprep.subr.mxu1 %v4017_v0  ;;  %v4795_v6 = vpop.permute.xlu1 %1342 }
 0x2a6   :  { %3697 = vmatprep.mubr.msk.f32.mxu1 %vm4018_vm1, %v4017_v0  ;;  %3709 = vmatpush3.msra.mxu0 %v4602_v30  ;;  %v4800_v10 = vpop.permute.xlu0 %1479  ;;  %v1190_v30 = vld [vmem:[%s5245_s0 + $0x190] sm:$0x3] }
 0x2a7   :  { %3740 = vmatpush3.msra.mxu1 %v4575_v11  ;;  %3710 = vmatprep.subr.mxu0 %v4017_v0 }
 0x2a8   :  { %3698 = vmatmul.mubr.msk.f32.gmra.mxu1 %vm400_vm6, %v920_v5  ;;  %3741 = vmatprep.subr.mxu1 %v4017_v0 }
 0x2a9   :  { %3711 = vmatpush3.msra.mxu0 %v4614_v32  ;;  %3742 = vmatpush3.msra.mxu1 %v4583_v27  ;;  %v4814_v14 = vpop.permute.xlu1 %1340  ;;  %v1189_v27 = vld [vmem:[%s5245_s0 + $0x188] sm:$0xff] }
 0x2aa   :  { %3712 = vmatprep.subr.mxu0 %v4017_v0  ;;  %3743 = vmatprep.subr.mxu1 %v4017_v0  ;;  %v4810_v12 = vpop.permute.xlu0 %1477 }
 0x2ab   :  { %3713 = vmatpush3.msra.mxu0 %v4631_v43  ;;  %3744 = vmatpush3.msra.mxu1 %v4594_v29  ;;  %v1323_v43 = vld [vmem:[%s5245_s0 + $0x198] sm:$0xff] }
 0x2ac   :  { %3714 = vmatprep.subr.mxu0 %v4017_v0  ;;  %3745 = vmatprep.subr.mxu1 %v4017_v0 }
 0x2ad   :  { %3715 = vmatpush3.msra.mxu0 %v4651_v46  ;;  %3746 = vmatpush3.msra.mxu1 %v4606_v31  ;;  %v4830_v18 = vpop.permute.xlu1 %1338 }
 0x2ae   :  { %3716 = vmatprep.subr.mxu0 %v4017_v0  ;;  %3747 = vmatprep.subr.mxu1 %v4017_v0  ;;  %v4822_v16 = vpop.permute.xlu0 %1475 }
 0x2af   :  { %3717 = vmatpush3.msra.mxu0 %v4663_v50  ;;  %3748 = vmatpush3.msra.mxu1 %v4621_v34  ;;  %v1460_v50 = vld [vmem:[%s5245_s0 + $0x1c0] sm:$0x3] }
 0x2b0   :  { %3718 = vmatprep.subr.mxu0 %v4017_v0  ;;  %3749 = vmatprep.subr.mxu1 %v4017_v0 }
 0x2b1   :  { %3719 = vmatpush3.msra.mxu0 %v4676_v54  ;;  %3750 = vmatpush3.msra.mxu1 %v4638_v42  ;;  %v1337_v23 = vpop.permute.xlu1 %1336  ;;  %v1324_v42 = vld [vmem:[%s5245_s0 + $0x1a0] sm:$0xff] }
 0x2b2   :  { %3720 = vmatprep.subr.mxu0 %v4017_v0  ;;  %3751 = vmatprep.subr.mxu1 %v4017_v0  ;;  %v1351_v20 = vpop.permute.xlu0 %1350  ;;  %v3138_v54 = vld [vmem:[%s5245_s0 + $0xe1] ss:$0 sm:$0xff] }
 0x2b3   :  { %3721 = vmatpush3.msra.mxu0 %v4688_v58  ;;  %3752 = vmatpush3.msra.mxu1 %v4679_v55  ;;  %v498_v55 = vadd.f32 %v3138_v54, %v4786_v4 }
 0x2b4   :  { %3722 = vmatprep.subr.mxu0 %v4017_v0  ;;  %3753 = vmatprep.subr.mxu1 %v4017_v0 }
 0x2b5   :  { %3723 = vmatpush3.msra.mxu0 %v4700_v62  ;;  %3754 = vmatpush3.msra.mxu1 %v4691_v59  ;;  %v1335_v9 = vpop.permute.xlu1 %1334  ;;  %v499_v59 = vadd.f32 %v3138_v54, %v4838_v21 }
 0x2b6   :  { %3724 = vmatprep.subr.mxu0 %v4017_v0  ;;  %3755 = vmatprep.subr.mxu1 %v4017_v0  ;;  %v1486_v22 = vpop.permute.xlu0 %1485 }
 0x2b7   :  { %3725 = vmatpush3.msra.mxu0 %v4712_v61  ;;  %3726 = vmatprep.mubr.msk.f32.mxu0 %vm4018_vm1, %v4017_v0 }
 0x2b8   :  { %3756 = vmatpush3.msra.mxu1 %v4703_v63  ;;  %3727 = vmatmul.mubr.msk.f32.vlgmr.msra.gmra.mxu0 %vm400_vm6, %v1053_v19 }
 0x2b9   :  { %3757 = vmatprep.subr.mxu1 %v4017_v0  ;;  %3770 = vmatprep.subr.mxu0 %v4017_v0  ;;  %v1333_v28 = vpop.permute.xlu1 %1332 }
 0x2ba   :  { %3758 = vmatpush3.msra.mxu1 %v4718_v2  ;;  %3771 = vmatpush3.msk.msra.mxu0 %vm410_vm5, %v1351_v20  ;;  %v1474_v24 = vpop.permute.xlu0 %1473 }
 0x2bb   :  { %3772 = vmatprep.subr.mxu0 %v4017_v0  ;;  %3759 = vmatprep.subr.mxu1 %v4017_v0 }
 0x2bc   :  { %3729 = vmatprep.mubr.msk.f32.mxu0 %vm4018_vm1, %v4017_v0  ;;  %3760 = vmatpush3.msra.mxu1 %v4727_v53  ;;  %v500_v53 = vadd.f32 %v3138_v54, %v4852_v15 }
 0x2bd   :  { %3761 = vmatprep.mubr.msk.f32.mxu1 %vm4018_vm1, %v4017_v0  ;;  %3773 = vmatpush3.msra.mxu0 %v4741_v45  ;;  %v1331_v31 = vpop.permute.xlu1 %1330 }
 0x2be   :  { %3730 = vmatmul.mubr.msk.f32.gmra.mxu0 %vm400_vm6, %v1054_v13  ;;  %3762 = vmatmul.mubr.msk.f32.vlgmr.msra.gmra.mxu1 %vm400_vm6, %v1188_v7  ;;  %v1472_v11 = vpop.permute.xlu0 %1471 }
 0x2bf   :  { %3774 = vmatprep.subr.mxu0 %v4017_v0  ;;  %3805 = vmatprep.subr.mxu1 %v4017_v0 }
 0x2c0   :  { %3775 = vmatpush3.msra.mxu0 %v4760_v40  ;;  %3806 = vmatpush3.msk.msra.mxu1 %vm410_vm5, %v1486_v22 }
 0x2c1   :  { %3776 = vmatprep.subr.mxu0 %v4017_v0  ;;  %3807 = vmatprep.subr.mxu1 %v4017_v0  ;;  %v1329_v33 = vpop.permute.xlu1 %1328 }
 0x2c2   :  { %3732 = vmatprep.mubr.msk.f32.mxu0 %vm4018_vm1, %v4017_v0  ;;  %3764 = vmatprep.mubr.msk.f32.mxu1 %vm4018_vm1, %v4017_v0  ;;  %v1470_v29 = vpop.permute.xlu0 %1469 }
 0x2c3   :  { %3777 = vmatpush3.msra.mxu0 %v4778_v60  ;;  %3808 = vmatpush3.msra.mxu1 %v4734_v49 }
 0x2c4   :  { %3733 = vmatmul.mubr.msk.f32.gmra.mxu0 %vm400_vm6, %v1055_v26  ;;  %3765 = vmatmul.mubr.msk.f32.gmra.mxu1 %vm400_vm6, %v1189_v27 }
 0x2c5   :  { %3778 = vmatprep.subr.mxu0 %v4017_v0  ;;  %3809 = vmatprep.subr.mxu1 %v4017_v0  ;;  %v1327_v35 = vpop.permute.xlu1 %1326 }
 0x2c6   :  { %3779 = vmatpush3.msra.mxu0 %v4795_v6  ;;  %3810 = vmatpush3.msra.mxu1 %v4782_v3  ;;  %v1468_v32 = vpop.permute.xlu0 %1467 }
 0x2c7   :  { %3780 = vmatprep.subr.mxu0 %v4017_v0  ;;  %3811 = vmatprep.subr.mxu1 %v4017_v0 }
 0x2c8   :  { %3767 = vmatprep.mubr.msk.f32.mxu1 %vm4018_vm1, %v4017_v0  ;;  %3781 = vmatpush3.msra.mxu0 %v4814_v14 }
 0x2c9   :  { %3812 = vmatpush3.msra.mxu1 %v4800_v10  ;;  %3782 = vmatprep.subr.mxu0 %v4017_v0  ;;  %v1462_v46 = vpop.permute.xlu1 %1461 }
 0x2ca   :  { %3768 = vmatmul.mubr.msk.f32.gmra.mxu1 %vm400_vm6, %v1190_v30  ;;  %3813 = vmatprep.subr.mxu1 %v4017_v0  ;;  %v1466_v34 = vpop.permute.xlu0 %1465 }
 0x2cb   :  { %3783 = vmatpush3.msra.mxu0 %v4830_v18  ;;  %3814 = vmatpush3.msra.mxu1 %v4810_v12 }
 0x2cc   :  { %3784 = vmatprep.subr.mxu0 %v4017_v0  ;;  %3815 = vmatprep.subr.mxu1 %v4017_v0 }
 0x2cd   :  { %3785 = vmatpush3.msra.mxu0 %v1337_v23  ;;  %3816 = vmatpush3.msra.mxu1 %v4822_v16 }
 0x2ce   :  { %3786 = vmatprep.subr.mxu0 %v4017_v0  ;;  %3817 = vmatprep.subr.mxu1 %v4017_v0  ;;  %v1464_v36 = vpop.permute.xlu0 %1463 }
 0x2cf   :  { %3787 = vmatpush3.msra.mxu0 %v1335_v9  ;;  %3818 = vmatpush3.msra.mxu1 %v1474_v24 }
 0x2d0   :  { %3788 = vmatprep.subr.mxu0 %v4017_v0  ;;  %3819 = vmatprep.subr.mxu1 %v4017_v0 }
 0x2d1   :  { %3789 = vmatpush3.msra.mxu0 %v1333_v28  ;;  %3820 = vmatpush3.msra.mxu1 %v1472_v11 }
 0x2d2   :  { %3790 = vmatprep.subr.mxu0 %v4017_v0  ;;  %3821 = vmatprep.subr.mxu1 %v4017_v0 }
 0x2d3   :  { %3791 = vmatpush3.msra.mxu0 %v1331_v31  ;;  %3822 = vmatpush3.msra.mxu1 %v1470_v29 }
 0x2d4   :  { %3792 = vmatprep.subr.mxu0 %v4017_v0  ;;  %3823 = vmatprep.subr.mxu1 %v4017_v0 }
 0x2d5   :  { %3793 = vmatpush3.msra.mxu0 %v1329_v33  ;;  %3824 = vmatpush3.msra.mxu1 %v1468_v32 }
 0x2d6   :  { %3794 = vmatprep.subr.mxu0 %v4017_v0  ;;  %3825 = vmatprep.subr.mxu1 %v4017_v0 }
 0x2d7   :  { %3795 = vmatpush3.msra.mxu0 %v1327_v35  ;;  %3796 = vmatprep.mubr.msk.f32.mxu0 %vm4018_vm1, %v4017_v0 }
 0x2d8   :  { %3826 = vmatpush3.msra.mxu1 %v1466_v34  ;;  %3797 = vmatmul.mubr.msk.f32.vlgmr.msra.gmra.mxu0 %vm400_vm6, %v1323_v43 }
 0x2d9   :  { %3827 = vmatprep.subr.mxu1 %v4017_v0  ;;  %3799 = vmatprep.mubr.msk.f32.mxu0 %vm4018_vm1, %v4017_v0 }
 0x2da   :  { %3828 = vmatpush3.msra.mxu1 %v1464_v36  ;;  %3831 = vmatprep.mubr.msk.f32.mxu1 %vm4018_vm1, %v4017_v0 }
 0x2db   :  { %3829 = vmatprep.subr.mxu1 %v4017_v0  ;;  %3840 = vmatprep.subr.mxu0 %v4017_v0 }
 0x2dc   :  { %3830 = vmatpush3.msra.mxu1 %v1462_v46  ;;  %3800 = vmatmul.mubr.msk.f32.gmra.mxu0 %vm400_vm6, %v1324_v42 }
 0x2dd   :  { %3832 = vmatmul.mubr.msk.f32.vlgmr.msra.gmra.mxu1 %vm400_vm6, %v1458_v38  ;;  %3802 = vmatprep.mubr.msk.f32.mxu0 %vm4018_vm1, %v4017_v0 }
 0x2de   :  { %3834 = vmatprep.mubr.msk.f32.mxu1 %vm4018_vm1, %v4017_v0  ;;  %3878 = vmatprep.subr.mxu1 %v4017_v0 }
 0x2df   :  { %3841 = vmatpush3.msra.mxu0 %v1596_v51 }
 0x2e0   :  { %3803 = vmatmul.mubr.msk.f32.gmra.mxu0 %vm400_vm6, %v1325_v37  ;;  %3851 = vmatprep.subr.mxu0 %v4017_v0 }
 0x2e1   :  { %3835 = vmatmul.mubr.msk.f32.gmra.mxu1 %vm400_vm6, %v1459_v47  ;;  %3842 = vmatprep.mubr.msk.f32.mxu0 %vm4018_vm1, %v4017_v0 }
 0x2e2   :  { %3837 = vmatprep.mubr.msk.f32.mxu1 %vm4018_vm1, %v4017_v0 }
 0x2e5   :  { %3838 = vmatmul.mubr.msk.f32.gmra.mxu1 %vm400_vm6, %v1460_v50 }
 0x2e6   :  { %3886 = vmatprep.mubr.msk.f32.mxu1 %vm4018_vm1, %v4017_v0 }
 0x338   :  { %v631_v58 = vpop.f32.mrf.mxu0 }
 0x339   :  { %v645_v62 = vadd.f32 %v631_v58, %v498_v55 }
 0x33a   :  { %v3588_v63 = vpop.f32.mrf.mxu0 }
 0x33b   :  { %v766_v61 = vpop.f32.mrf.mxu1 }
 0x33c   :  { %v780_v1 = vadd.f32 %v766_v61, %v645_v62  ;;  %v636_v2 = vpop.f32.mrf.mxu0 }
 0x33d   :  { %v646_v56 = vadd.f32 %v636_v2, %v499_v59  ;;  %v3623_v49 = vpop.f32.mrf.mxu1 }
 0x33e   :  { %v3591_v45 = vpop.f32.mrf.mxu0 }
 0x33f   :  { %v771_v48 = vpop.f32.mrf.mxu1 }
 0x340   :  { %v781_v39 = vadd.f32 %v771_v48, %v646_v56  ;;  %v641_v44 = vpop.f32.mrf.mxu0 }
 0x341   :  { %v647_v40 = vadd.f32 %v641_v44, %v500_v53  ;;  %v3626_v52 = vpop.f32.mrf.mxu1 }
 0x342   :  { %v3594_v41 = vpop.f32.mrf.mxu0 }
 0x354   :  { %v776_v57 = vpop.f32.mrf.mxu1 }
 0x355   :  { %v782_v60 = vadd.f32 %v776_v57, %v647_v40 }
 0x356   :  { %v3629_v3 = vpop.f32.mrf.mxu1 }
 0x358   :  { %v901_v4 = vpop.f32.mrf.mxu0 }
 0x359   :  { %v915_v28 = vadd.f32 %v901_v4, %v780_v1  ;;  %v1688_v4 = vld [vmem:[%s5245_s0 + $0x1c8] sm:$0xff] }
 0x35a   :  { %v3658_v5 = vpop.f32.mrf.mxu0 }
 0x35d   :  { %v906_v6 = vpop.f32.mrf.mxu0  ;;  %v1036_v8 = vpop.f32.mrf.mxu1 }
 0x35e   :  { %v1050_v29 = vadd.f32 %v1036_v8, %v915_v28  ;;  %v916_v30 = vadd.f32 %v906_v6, %v781_v39  ;;  %v1771_v8 = vld [vmem:[%s5245_s0 + $0x1d0] sm:$0xff] }
 0x35f   :  { %v3661_v10 = vpop.f32.mrf.mxu0  ;;  %v3693_v12 = vpop.f32.mrf.mxu1 }
 0x362   :  { %v911_v14 = vpop.f32.mrf.mxu0  ;;  %v1041_v16 = vpop.f32.mrf.mxu1 }
 0x363   :  { %v1051_v33 = vadd.f32 %v1041_v16, %v916_v30  ;;  %v917_v43 = vadd.f32 %v911_v14, %v782_v60  ;;  %v1858_v16 = vld [vmem:[%s5245_s0 + $0x1d8] sm:$0xff]  ;;  %v1972_v30 = vld [vmem:[%s5245_s0 + $0x30] sm:$0xff] }
 0x364   :  { %v3696_v18 = vpop.f32.mrf.mxu1  ;;  %v3664_v20 = vpop.f32.mrf.mxu0 }
 0x368   :  { %v1046_v21 = vpop.f32.mrf.mxu1 }
 0x369   :  { %v1052_v37 = vadd.f32 %v1046_v21, %v917_v43 }
 0x36a   :  { %v3699_v19 = vpop.f32.mrf.mxu1 }
 0x36b   :  { %v3176_v19 = vld [vmem:[%s5245_s0 + $0xe2] ss:$0 sm:$0xff] }
 0x378   :  { %v1171_v22 = vpop.f32.mrf.mxu0 }
 0x379   :  { %v1185_v31 = vadd.f32 %v1171_v22, %v1050_v29  ;;  %v1973_v29 = vld [vmem:[%s5245_s0 + $0x38] sm:$0xff] }
 0x37a   :  { %v3728_v17 = vpop.f32.mrf.mxu0  ;;  %3879 = vmatpush3.msra.mxu1 %v1973_v29 }
 0x37b   :  { %3880 = vmatprep.subr.mxu1 %v4017_v0 }
 0x37c   :  { %3881 = vmatpush3.msra.mxu1 %v1972_v30 }
 0x37d   :  { %3882 = vmatprep.subr.mxu1 %v4017_v0 }
 0x37e   :  { %v1176_v23 = vpop.f32.mrf.mxu0  ;;  %v1306_v15 = vpop.f32.mrf.mxu1 }
 0x37f   :  { %v1320_v34 = vadd.f32 %v1306_v15, %v1185_v31  ;;  %v1186_v36 = vadd.f32 %v1176_v23, %v1051_v33  ;;  %v1971_v31 = vld [vmem:[%s5245_s0 + $0x28] sm:$0xff] }
 0x380   :  { %v3731_v24 = vpop.f32.mrf.mxu0  ;;  %v3763_v25 = vpop.f32.mrf.mxu1  ;;  %3883 = vmatpush3.msra.mxu1 %v1971_v31 }
 0x381   :  { %3884 = vmatprep.subr.mxu1 %v4017_v0 }
 0x384   :  { %v1181_v13 = vpop.f32.mrf.mxu0  ;;  %v1311_v7 = vpop.f32.mrf.mxu1 }
 0x385   :  { %v1321_v47 = vadd.f32 %v1311_v7, %v1186_v36  ;;  %v1187_v55 = vadd.f32 %v1181_v13, %v1052_v37  ;;  %v3181_v36 = vld [vmem:[%s5245_s0 + $0xe3] ss:$0 sm:$0xff] }
 0x386   :  { %v3766_v9 = vpop.f32.mrf.mxu1  ;;  %v3734_v11 = vpop.f32.mrf.mxu0 }
 0x38a   :  { %v1316_v26 = vpop.f32.mrf.mxu1 }
 0x38b   :  { %v1322_v61 = vadd.f32 %v1316_v26, %v1187_v55 }
 0x38c   :  { %v3769_v27 = vpop.f32.mrf.mxu1 }
 0x398   :  { %v1441_v32 = vpop.f32.mrf.mxu0 }
 0x399   :  { %v1455_v42 = vadd.f32 %v1441_v32, %v1320_v34  ;;  %v1970_v32 = vld [vmem:[%s5245_s0 + $0x20] sm:$0xff] }
 0x39a   :  { %v3798_v35 = vpop.f32.mrf.mxu0  ;;  %3885 = vmatpush3.msra.mxu1 %v1970_v32 }
 0x39b   :  { %3889 = vmatprep.subr.mxu1 %v4017_v0 }
 0x39c   :  { %v1446_v38 = vpop.f32.mrf.mxu0 }
 0x39d   :  { %v1576_v46 = vpop.f32.mrf.mxu1  ;;  %v1456_v58 = vadd.f32 %v1446_v38, %v1321_v47  ;;  %v3182_v38 = vld [vmem:[%s5245_s0 + $0xe4] ss:$0 sm:$0xff]  ;;  %v3183_v47 = vld [vmem:[%s5245_s0 + $0xe5] ss:$0 sm:$0xff] }
 0x39e   :  { %v1590_v50 = vadd.f32 %v1576_v46, %v1455_v42  ;;  %v3801_v51 = vpop.f32.mrf.mxu0 }
 0x39f   :  { %v3833_v54 = vpop.f32.mrf.mxu1 }
 0x3a0   :  { %v1593_v59 = vmax.f32 %v1590_v50, 0.0  ;;  %v1451_v62 = vpop.f32.mrf.mxu0 }
 0x3a1   :  { %v1581_v63 = vpop.f32.mrf.mxu1  ;;  %v1457_v56 = vadd.f32 %v1451_v62, %v1322_v61 }
 0x3a2   :  { %v1591_v1 = vadd.f32 %v1581_v63, %v1456_v58  ;;  %3843 = vmatmul.mubr.msk.f32.vlgmr.msra.gmra.mxu0 %vm1597_vm7, %v1593_v59  ;;  %v3804_v2 = vpop.f32.mrf.mxu0 }
 0x3a3   :  { %v3836_v53 = vpop.f32.mrf.mxu1  ;;  %3845 = vmatprep.mubr.msk.f32.mxu0 %vm4018_vm1, %v4017_v0  ;;  %v2052_v2 = vld [vmem:[%s5247_s2] sm:$0xff]  ;;  %s4027_s2 = smov 56  }
 0x3a4   :  { %v1594_v49 = vmax.f32 %v1591_v1, 0.0 }
 0x3a5   :  { %v1586_v45 = vpop.f32.mrf.mxu1 }
 0x3a6   :  { %v1592_v48 = vadd.f32 %v1586_v45, %v1457_v56  ;;  %3846 = vmatmul.mubr.msk.f32.gmra.mxu0 %vm1597_vm7, %v1594_v49 }
 0x3a7   :  { %3848 = vmatprep.mubr.msk.f32.mxu0 %vm4018_vm1, %v4017_v0  ;;  %v3839_v39 = vpop.f32.mrf.mxu1 }
 0x3a8   :  { %v1595_v44 = vmax.f32 %v1592_v48, 0.0 }
 0x3aa   :  { %3849 = vmatmul.mubr.msk.f32.gmra.mxu0 %vm1597_vm7, %v1595_v44 }
 0x3ab   :  { %3857 = vmatprep.mubr.msk.f32.mxu0 %vm4018_vm1, %v4017_v0 }
 0x462   :  { %v1673_v40 = vpop.f32.mrf.mxu0 }
 0x464   :  { %v3844_v52 = vpop.f32.mrf.mxu0 }
 0x466   :  { %v1678_v41 = vpop.f32.mrf.mxu0 }
 0x467   :  { %1776 = vrot.lane.b32.xlu1 %v1678_v41, %s4022_s21 }
 0x468   :  { %v3847_v57 = vpop.f32.mrf.mxu0 }
 0x46a   :  { %v1683_v60 = vpop.f32.mrf.mxu0 }
 0x46b   :  { %1863 = vrot.lane.b32.xlu1 %v1683_v60, %s4025_s30  ;;  %1778 = vrot.lane.b32.xlu0 %v1683_v60, %s4022_s21 }
 0x46c   :  { %3852 = vmatpush3.msk.msra.mxu0 %vm410_vm5, %v1683_v60  ;;  %v3850_v3 = vpop.f32.mrf.mxu0 }
 0x46d   :  { %3853 = vmatprep.subr.mxu0 %v4017_v0 }
 0x46e   :  { %3854 = vmatpush3.msra.mxu0 %v1678_v41 }
 0x46f   :  { %3855 = vmatprep.subr.mxu0 %v4017_v0  ;;  %1859 = vrot.lane.b32.xlu1 %v1673_v40, %s4025_s30 }
 0x470   :  { %1774 = vrot.lane.b32.xlu0 %v1673_v40, %s4022_s21  ;;  %3856 = vmatpush3.msra.mxu0 %v1673_v40 }
 0x471   :  { %3860 = vmatprep.subr.mxu0 %v4017_v0  ;;  %3858 = vmatmul.mubr.msk.f32.vlgmr.msra.gmra.mxu0 %vm1689_vm8, %v1688_v4 }
 0x472   :  { %3866 = vmatprep.mubr.msk.f32.mxu0 %vm4018_vm1, %v4017_v0 }
 0x474   :  { %1861 = vrot.lane.b32.xlu0 %v1678_v41, %s4025_s30 }
 0x4d9   :  { %v1777_v5 = vpop.permute.xlu1 %1776 }
 0x4dd   :  { %v1779_v6 = vpop.permute.xlu0 %1778  ;;  %v1864_v10 = vpop.permute.xlu1 %1863 }
 0x4de   :  { %3861 = vmatpush3.msk.msra.mxu0 %vm410_vm5, %v1779_v6 }
 0x4df   :  { %3862 = vmatprep.subr.mxu0 %v4017_v0 }
 0x4e0   :  { %3863 = vmatpush3.msra.mxu0 %v1777_v5 }
 0x4e1   :  { %3864 = vmatprep.subr.mxu0 %v4017_v0  ;;  %v1860_v18 = vpop.permute.xlu1 %1859 }
 0x4e2   :  { %v1775_v12 = vpop.permute.xlu0 %1774 }
 0x4e3   :  { %3865 = vmatpush3.msra.mxu0 %v1775_v12 }
 0x4e4   :  { %3869 = vmatprep.subr.mxu0 %v4017_v0  ;;  %3867 = vmatmul.mubr.msk.f32.vlgmr.msra.gmra.mxu0 %vm1689_vm8, %v1771_v8 }
 0x4e5   :  { %3870 = vmatpush3.msk.msra.mxu0 %vm410_vm5, %v1864_v10  ;;  %3875 = vmatprep.mubr.msk.f32.mxu0 %vm4018_vm1, %v4017_v0 }
 0x4e6   :  { %v1862_v14 = vpop.permute.xlu0 %1861  ;;  %3871 = vmatprep.subr.mxu0 %v4017_v0 }
 0x4e7   :  { %3872 = vmatpush3.msra.mxu0 %v1862_v14 }
 0x4e8   :  { %3873 = vmatprep.subr.mxu0 %v4017_v0 }
 0x4e9   :  { %3874 = vmatpush3.msra.mxu0 %v1860_v18 }
 0x4ea   :  { %3876 = vmatmul.mubr.msk.f32.vlgmr.msra.gmra.mxu0 %vm1689_vm8, %v1858_v16  ;;  %3899 = vmatprep.subr.mxu0 %v4017_v0 }
 0x4eb   :  { %3901 = vmatprep.mubr.msk.f32.mxu0 %vm4018_vm1, %v4017_v0 }
 0x531   :  { %v1762_v20 = vpop.f32.mrf.mxu0 }
 0x532   :  { %v1770_v23 = vadd.f32 %v3176_v19, %v1762_v20 }
 0x533   :  { %v3859_v21 = vpop.f32.mrf.mxu0 }
 0x5a4   :  { %v1853_v22 = vpop.f32.mrf.mxu0 }
 0x5a5   :  { %v1857_v15 = vadd.f32 %v1853_v22, %v1770_v23 }
 0x5a6   :  { %v3868_v17 = vpop.f32.mrf.mxu0 }
 0x5aa   :  { %v1938_v24 = vpop.f32.mrf.mxu0 }
 0x5ab   :  { %v5027_v25 = vadd.f32 %v1938_v24, %v1857_v15 }
 0x5ac   :  { %v3877_v13 = vpop.f32.mrf.mxu0 }
 0x5ad   :  { %v1946_v7 = vsel %vm1945_vm9, %v5027_v25, 0.0 }
 0x5ae   :  { %1947 = vadd.xlane.f32.xlu0 %v1946_v7 }
 0x637   :  { %v1948_v9 = vpop.xlane.xlu0 %1947 }
 0x638   :  { %v1950_v11 = vmul.f32 0.03125, %v1948_v9 }
 0x63a   :  { %v1951_v26 = vsub.f32 %v5027_v25, %v1950_v11 }
 0x63c   :  { %v1952_v27 = vmul.f32 %v1951_v26, %v1951_v26 }
 0x63e   :  { %v1953_v28 = vsel %vm1945_vm9, %v1952_v27, 0.0 }
 0x63f   :  { %1954 = vadd.xlane.f32.xlu1 %v1953_v28 }
 0x6c8   :  { %v1955_v33 = vpop.xlane.xlu1 %1954 }
 0x6c9   :  { %v1956_v34 = vmul.f32 0.03125, %v1955_v33 }
 0x6cb   :  { %v1957_v35 = vadd.f32 1e-05, %v1956_v34 }
 0x6cd   :  { %3997 = vrsqrt.f32 %v1957_v35 }
 0x6da   :  { %v3998_v43 = vpop.eup %3997 }
 0x6db   :  { %v1959_v42 = vmul.f32 %v3998_v43, %v1951_v26 }
 0x6dd   :  { %v1964_v46 = vmul.f32 %v3181_v36, %v1959_v42 }
 0x6df   :  { %v1969_v37 = vadd.f32 %v3182_v38, %v1964_v46 }
 0x6e1   :  { %3887 = vmatmul.mubr.msk.f32.vlgmr.msra.gmra.mxu1 %vm1945_vm9, %v1969_v37 }
 0x6e2   :  { %3891 = vmatprep.mubr.msk.f32.mxu1 %vm4018_vm1, %v4017_v0 }
 0x7a1   :  { %v2048_v50 = vpop.f32.mrf.mxu1 }
 0x7a2   :  { %v5061_v51 = vadd.f32 %v3183_v47, %v2048_v50 }
 0x7a3   :  { %v3888_v54 = vpop.f32.mrf.mxu1 }
 0x7a4   :  { %2221 = vrot.lane.b32.xlu1 %v5061_v51, %s4024_s25  ;;  %2054 = vrot.lane.b32.xlu0 %v5061_v51, %s4022_s21  ;;  %s4029_s21 = smov 40  }
 0x7a8   :  { %2388 = vrot.lane.b32.xlu1 %v5061_v51, %s4023_s24  ;;  %2219 = vrot.lane.b32.xlu0 %v5061_v51, %s4019_s1 }
 0x7ac   :  { %2555 = vrot.lane.b32.xlu1 %v5061_v51, %s4026_s4  ;;  %2386 = vrot.lane.b32.xlu0 %v5061_v51, %s4020_s19 }
 0x7b0   :  { %2553 = vrot.lane.b32.xlu0 %v5061_v51, %s4021_s20  ;;  %s4028_s20 = smov 48  }
 0x816   :  { %v2222_v55 = vpop.permute.xlu1 %2221  ;;  %v2055_v58 = vpop.permute.xlu0 %2054 }
 0x817   :  { %3890 = vmatpush3.xpose.msk.msra.mxu1 %vm1597_vm7, %v2055_v58  ;;  %3900 = vmatpush3.xpose.msk.msra.mxu0 %vm1597_vm7, %v2222_v55 }
 0x818   :  { %3909 = vmatprep.subr.mxu0 %v4017_v0  ;;  %3894 = vmatprep.subr.mxu1 %v4017_v0 }
 0x81a   :  { %v2389_v59 = vpop.permute.xlu1 %2388  ;;  %3892 = vmatmul.mubr.msk.f32.vlgmr.msra.gmra.mxu1 %vm1597_vm7, %v5061_v51  ;;  %v2220_v62 = vpop.permute.xlu0 %2219 }
 0x81b   :  { %3902 = vmatmul.mubr.msk.f32.vlgmr.msra.gmra.mxu0 %vm1597_vm7, %v2220_v62  ;;  %3896 = vmatprep.mubr.msk.f32.mxu1 %vm4018_vm1, %v4017_v0 }
 0x81c   :  { %3910 = vmatpush3.xpose.msk.msra.mxu0 %vm1597_vm7, %v2389_v59  ;;  %3911 = vmatprep.mubr.msk.f32.mxu0 %vm4018_vm1, %v4017_v0  ;;  %v2740_v59 = vld [vmem:[%s5245_s0 + $0x58] sm:$0xff] }
 0x81d   :  { %3919 = vmatprep.subr.mxu0 %v4017_v0 }
 0x81e   :  { %v2556_v63 = vpop.permute.xlu1 %2555  ;;  %v2387_v61 = vpop.permute.xlu0 %2386 }
 0x81f   :  { %3912 = vmatmul.mubr.msk.f32.vlgmr.msra.gmra.mxu0 %vm1597_vm7, %v2387_v61 }
 0x820   :  { %3920 = vmatpush3.xpose.msk.msra.mxu0 %vm1597_vm7, %v2556_v63  ;;  %3921 = vmatprep.mubr.msk.f32.mxu0 %vm4018_vm1, %v4017_v0 }
 0x821   :  { %3929 = vmatprep.subr.mxu0 %v4017_v0 }
 0x822   :  { %v2554_v1 = vpop.permute.xlu0 %2553 }
 0x823   :  { %3922 = vmatmul.mubr.msk.f32.vlgmr.msra.gmra.mxu0 %vm1597_vm7, %v2554_v1 }
 0x824   :  { %3937 = vmatprep.mubr.msk.f32.mxu0 %vm4018_vm1, %v4017_v0  ;;  %3930 = vmatpush3.msra.mxu0 %v2740_v59 }
 0x825   :  { %3931 = vmatprep.subr.mxu0 %v4017_v0 }
 0x8da   :  { %v2126_v53 = vpop.f32.mrf.mxu1 }
 0x8db   :  { %v2130_v56 = vmul.f32 0.35355338, %v2126_v53  ;;  %v2293_v49 = vpop.f32.mrf.mxu0  ;;  %v2738_v53 = vld [vmem:[%s5245_s0 + $0x48] sm:$0xff] }
 0x8dc   :  { %v2297_v45 = vmul.f32 0.35355338, %v2293_v49  ;;  %v3893_v48 = vpop.f32.mrf.mxu1 }
 0x8dd   :  { %v2131_v39 = vadd.f32 %v2130_v56, %v2052_v2  ;;  %v3903_v44 = vpop.f32.mrf.mxu0  ;;  %v2737_v56 = vld [vmem:[%s5245_s0 + $0x40] sm:$0xff] }
 0x8de   :  { %v2298_v40 = vadd.f32 %v2297_v45, %v2052_v2 }
 0x8df   :  { %v2460_v52 = vpop.f32.mrf.mxu0  ;;  %v2132_v41 = vsel %vm1597_vm7, %v2131_v39, -inf }
 0x8e0   :  { %v2464_v57 = vmul.f32 0.35355338, %v2460_v52  ;;  %2133 = vmax.xlane.f32.xlu1 %v2132_v41  ;;  %v2299_v60 = vsel %vm1597_vm7, %v2298_v40, -inf }
 0x8e1   :  { %2300 = vmax.xlane.f32.xlu0 %v2299_v60  ;;  %v3913_v3 = vpop.f32.mrf.mxu0 }
 0x8e2   :  { %v2465_v4 = vadd.f32 %v2464_v57, %v2052_v2 }
 0x8e3   :  { %v2627_v5 = vpop.f32.mrf.mxu0 }
 0x8e4   :  { %v2631_v6 = vmul.f32 0.35355338, %v2627_v5  ;;  %v2466_v8 = vsel %vm1597_vm7, %v2465_v4, -inf }
 0x8e5   :  { %2467 = vmax.xlane.f32.xlu0 %v2466_v8  ;;  %v3923_v10 = vpop.f32.mrf.mxu0 }
 0x8e6   :  { %v2632_v12 = vadd.f32 %v2631_v6, %v2052_v2  ;;  %v2739_v2 = vld [vmem:[%s5245_s0 + $0x50] sm:$0xff] }
 0x8e7   :  { %3932 = vmatpush3.msra.mxu0 %v2739_v2 }
 0x8e8   :  { %v2633_v14 = vsel %vm1597_vm7, %v2632_v12, -inf  ;;  %3933 = vmatprep.subr.mxu0 %v4017_v0 }
 0x8e9   :  { %2634 = vmax.xlane.f32.xlu1 %v2633_v14  ;;  %3934 = vmatpush3.msra.mxu0 %v2738_v53 }
 0x8ea   :  { %3935 = vmatprep.subr.mxu0 %v4017_v0 }
 0x8eb   :  { %3936 = vmatpush3.msra.mxu0 %v2737_v56 }
 0x8ec   :  { %3951 = vmatprep.subr.mxu0 %v4017_v0 }
 0x8fa   :  { %2310 = vrot.lane.b32.xlu1 %v5061_v51, %s4027_s2 }
 0x969   :  { %v2134_v16 = vpop.xlane.xlu1 %2133 }
 0x96a   :  { %v2135_v18 = vsub.f32 %v2131_v39, %v2134_v16  ;;  %v2301_v20 = vpop.xlane.xlu0 %2300 }
 0x96b   :  { %v2302_v21 = vsub.f32 %v2298_v40, %v2301_v20 }
 0x96c   :  { %v2136_v19 = vmul.f32 1.442695, %v2135_v18 }
 0x96d   :  { %v2303_v22 = vmul.f32 1.442695, %v2302_v21  ;;  %v2849_v21 = vld [vmem:[%s5245_s0 + $0x78] sm:$0xff] }
 0x96e   :  { %3999 = vpow2.f32 %v2136_v19  ;;  %v2468_v27 = vpop.xlane.xlu0 %2467  ;;  %v2847_v19 = vld [vmem:[%s5245_s0 + $0x68] sm:$0xff] }
 0x96f   :  { %4001 = vpow2.f32 %v2303_v22  ;;  %v2469_v28 = vsub.f32 %v2465_v4, %v2468_v27  ;;  %v3198_v4 = vld [vmem:[%s5245_s0 + $0xe6] ss:$0 sm:$0xff]  ;;  %v3199_v27 = vld [vmem:[%s5245_s0 + $0xe7] ss:$0 sm:$0xff] }
 0x970   :  { %v2846_v22 = vld [vmem:[%s5245_s0 + $0x60] sm:$0xff] }
 0x971   :  { %v2470_v29 = vmul.f32 1.442695, %v2469_v28 }
 0x972   :  { %v2635_v17 = vpop.xlane.xlu1 %2634 }
 0x973   :  { %v2636_v23 = vsub.f32 %v2632_v12, %v2635_v17  ;;  %v2936_v17 = vld [vmem:[%s5245_s0 + $0xb8] sm:$0xff] }
 0x975   :  { %v2637_v15 = vmul.f32 1.442695, %v2636_v23  ;;  %v2935_v23 = vld [vmem:[%s5245_s0 + $0xb0] sm:$0xff] }
 0x976   :  { %v2311_v32 = vpop.permute.xlu1 %2310 }
 0x977   :  { %4003 = vpow2.f32 %v2637_v15  ;;  %v2934_v15 = vld [vmem:[%s5245_s0 + $0xa8] sm:$0xff] }
 0x978   :  { %4005 = vpow2.f32 %v2470_v29  ;;  %v3200_v29 = vld [vmem:[%s5245_s0 + $0xe8] ss:$0 sm:$0xff] }
 0x97b   :  { %v4000_v24 = vpop.eup %3999 }
 0x97c   :  { %v4002_v13 = vpop.eup %4001  ;;  %v2138_v7 = vsel %vm1597_vm7, %v4000_v24, 0.0 }
 0x97d   :  { %2139 = vadd.xlane.f32.xlu0 %v2138_v7  ;;  %v2305_v9 = vsel %vm1597_vm7, %v4002_v13, 0.0 }
 0x97e   :  { %2306 = vadd.xlane.f32.xlu1 %v2305_v9 }
 0x984   :  { %v4004_v11 = vpop.eup %4003 }
 0x985   :  { %v2639_v26 = vsel %vm1597_vm7, %v4004_v11, 0.0  ;;  %v4006_v30 = vpop.eup %4005 }
 0x986   :  { %2640 = vadd.xlane.f32.xlu1 %v2639_v26  ;;  %v2472_v31 = vsel %vm1597_vm7, %v4006_v30, 0.0 }
 0x993   :  { %2143 = vrot.lane.b32.xlu0 %v5061_v51, %s4025_s30  ;;  %s4030_s30 = smov 8  }
 0x997   :  { %2477 = vrot.lane.b32.xlu1 %v5061_v51, %s4028_s20 }
 0x9b2   :  { %2473 = vadd.xlane.f32.xlu0 %v2472_v31 }
 0x9c8   :  { %2644 = vrot.lane.b32.xlu0 %v5061_v51, %s4029_s21 }
 0xa06   :  { %v2140_v33 = vpop.xlane.xlu0 %2139 }
 0xa07   :  { %4007 = vrcp.f32 %v2140_v33  ;;  %v2307_v34 = vpop.xlane.xlu1 %2306  ;;  %v2930_v33 = vld [vmem:[%s5245_s0 + $0x88] sm:$0xff] }
 0xa08   :  { %4009 = vrcp.f32 %v2307_v34  ;;  %v2929_v34 = vld [vmem:[%s5245_s0 + $0x80] sm:$0xff] }
 0xa0a   :  { %v2144_v35 = vpop.permute.xlu0 %2143 }
 0xa0b   :  { %3895 = vmatpush3.msra.mxu1 %v2144_v35  ;;  %v3021_v35 = vld [vmem:[%s5245_s0 + $0xd8] sm:$0xff] }
 0xa0c   :  { %3904 = vmatprep.subr.mxu1 %v4017_v0 }
 0xa0f   :  { %v2641_v36 = vpop.xlane.xlu1 %2640 }
 0xa13   :  { %v2478_v37 = vpop.permute.xlu1 %2477 }
 0xa14   :  { %v4008_v43 = vpop.eup %4007 }
 0xa15   :  { %v2142_v42 = vmul.f32 %v4008_v43, %v4000_v24  ;;  %v4010_v38 = vpop.eup %4009  ;;  %v2933_v24 = vld [vmem:[%s5245_s0 + $0xa0] sm:$0xff]  ;;  %v3201_v43 = vld [vmem:[%s5245_s0 + $0xe9] ss:$0 sm:$0xff] }
 0xa16   :  { %v2309_v46 = vmul.f32 %v4010_v38, %v4002_v13  ;;  %v2932_v13 = vld [vmem:[%s5245_s0 + $0x98] sm:$0xff] }
 0xa17   :  { %3897 = vmatmul.mubr.msk.f32.vlgmr.msra.gmra.mxu1 %vm1597_vm7, %v2142_v42 }
 0xa18   :  { %3905 = vmatpush3.msra.mxu1 %v2311_v32  ;;  %3906 = vmatprep.mubr.msk.f32.mxu1 %vm4018_vm1, %v4017_v0  ;;  %v2931_v32 = vld [vmem:[%s5245_s0 + $0x90] sm:$0xff] }
 0xa19   :  { %3914 = vmatprep.subr.mxu1 %v4017_v0 }
 0xa1b   :  { %3907 = vmatmul.mubr.msk.f32.vlgmr.msra.gmra.mxu1 %vm1597_vm7, %v2309_v46 }
 0xa1c   :  { %3915 = vmatpush3.msra.mxu1 %v2478_v37  ;;  %3916 = vmatprep.mubr.msk.f32.mxu1 %vm4018_vm1, %v4017_v0  ;;  %v3020_v37 = vld [vmem:[%s5245_s0 + $0xd0] sm:$0xff] }
 0xa1d   :  { %3924 = vmatprep.subr.mxu1 %v4017_v0 }
 0xa3b   :  { %v2474_v47 = vpop.xlane.xlu0 %2473 }
 0xa3c   :  { %4011 = vrcp.f32 %v2474_v47  ;;  %v3019_v47 = vld [vmem:[%s5245_s0 + $0xc8] sm:$0xff] }
 0xa3d   :  { %4013 = vrcp.f32 %v2641_v36 }
 0xa3f   :  { %v2645_v55 = vpop.permute.xlu0 %2644 }
 0xa49   :  { %v4012_v50 = vpop.eup %4011 }
 0xa4a   :  { %v2476_v51 = vmul.f32 %v4012_v50, %v4006_v30  ;;  %v4014_v54 = vpop.eup %4013  ;;  %v3018_v50 = vld [vmem:[%s5245_s0 + $0xc0] sm:$0xff] }
 0xa4b   :  { %v2643_v58 = vmul.f32 %v4014_v54, %v4004_v11  ;;  %v3204_v54 = vld [vmem:[%s5245_s0 + $0xea] ss:$0 sm:$0xff] }
 0xa4c   :  { %3917 = vmatmul.mubr.msk.f32.vlgmr.msra.gmra.mxu1 %vm1597_vm7, %v2476_v51 }
 0xa4d   :  { %3925 = vmatpush3.msra.mxu1 %v2645_v55  ;;  %3926 = vmatprep.mubr.msk.f32.mxu1 %vm4018_vm1, %v4017_v0 }
 0xa4e   :  { %3940 = vmatprep.subr.mxu1 %v4017_v0 }
 0xa50   :  { %3927 = vmatmul.mubr.msk.f32.vlgmr.msra.gmra.mxu1 %vm1597_vm7, %v2643_v58 }
 0xa51   :  { %3948 = vmatprep.mubr.msk.f32.mxu1 %vm4018_vm1, %v4017_v0  ;;  %3941 = vmatpush3.msra.mxu1 %v2849_v21 }
 0xa52   :  { %3942 = vmatprep.subr.mxu1 %v4017_v0 }
 0xad7   :  { %v2215_v62 = vpop.f32.mrf.mxu1 }
 0xad9   :  { %v3898_v63 = vpop.f32.mrf.mxu1 }
 0xadb   :  { %v2382_v61 = vpop.f32.mrf.mxu1 }
 0xadc   :  { %2721 = vrot.lane.b32.xlu1 %v2382_v61, %s4030_s30 }
 0xadd   :  { %v3908_v1 = vpop.f32.mrf.mxu1 }
 0xb0c   :  { %v2549_v49 = vpop.f32.mrf.mxu1 }
 0xb0d   :  { %2725 = vrot.lane.b32.xlu0 %v2549_v49, %s4031_s29 }
 0xb0e   :  { %v3918_v45 = vpop.f32.mrf.mxu1 }
 0xb10   :  { %v2716_v48 = vpop.f32.mrf.mxu1 }
 0xb11   :  { %2729 = vrot.lane.b32.xlu1 %v2716_v48, %s4032_s5 }
 0xb12   :  { %v3928_v39 = vpop.f32.mrf.mxu1 }
 0xb4e   :  { %v2722_v44 = vpop.permute.xlu1 %2721 }
 0xb4f   :  { %v2732_v52 = vsel %vm1597_vm7, %v2215_v62, %v2722_v44  ;;  %v3205_v62 = vld [vmem:[%s5245_s0 + $0xeb] ss:$0 sm:$0xff] }
 0xb7f   :  { %v2726_v40 = vpop.permute.xlu0 %2725 }
 0xb80   :  { %v2734_v41 = vsel %vm2733_vm10, %v2732_v52, %v2726_v40 }
 0xb83   :  { %v2730_v57 = vpop.permute.xlu1 %2729 }
 0xb84   :  { %v2736_v60 = vsel %vm2735_vm11, %v2734_v41, %v2730_v57 }
 0xb85   :  { %3938 = vmatmul.mubr.msk.f32.vlgmr.msra.gmra.mxu0 %vm1945_vm9, %v2736_v60 }
 0xb86   :  { %3967 = vmatprep.mubr.msk.f32.mxu0 %vm4018_vm1, %v4017_v0  ;;  %3952 = vmatpush3.msra.mxu0 %v2936_v17 }
 0xb87   :  { %3953 = vmatprep.subr.mxu0 %v4017_v0 }
 0xb88   :  { %3954 = vmatpush3.msra.mxu0 %v2935_v23 }
 0xb89   :  { %3955 = vmatprep.subr.mxu0 %v4017_v0 }
 0xb8a   :  { %3956 = vmatpush3.msra.mxu0 %v2934_v15 }
 0xb8b   :  { %3957 = vmatprep.subr.mxu0 %v4017_v0 }
 0xb8c   :  { %3958 = vmatpush3.msra.mxu0 %v2933_v24 }
 0xb8d   :  { %3959 = vmatprep.subr.mxu0 %v4017_v0 }
 0xb8e   :  { %3960 = vmatpush3.msra.mxu0 %v2932_v13 }
 0xb8f   :  { %3961 = vmatprep.subr.mxu0 %v4017_v0 }
 0xb90   :  { %3962 = vmatpush3.msra.mxu0 %v2931_v32 }
 0xb91   :  { %3963 = vmatprep.subr.mxu0 %v4017_v0 }
 0xb92   :  { %3964 = vmatpush3.msra.mxu0 %v2930_v33 }
 0xb93   :  { %3965 = vmatprep.subr.mxu0 %v4017_v0 }
 0xb94   :  { %3966 = vmatpush3.msra.mxu0 %v2929_v34 }
 0xc45   :  { %v2810_v3 = vpop.f32.mrf.mxu0 }
 0xc46   :  { %v2814_v5 = vadd.f32 %v2810_v3, %v5027_v25  ;;  %v2848_v25 = vld [vmem:[%s5245_s0 + $0x70] sm:$0xff] }
 0xc47   :  { %v3939_v6 = vpop.f32.mrf.mxu0  ;;  %3943 = vmatpush3.msra.mxu1 %v2848_v25 }
 0xc48   :  { %v5154_v8 = vadd.f32 %v3198_v4, %v2814_v5  ;;  %3944 = vmatprep.subr.mxu1 %v4017_v0 }
 0xc49   :  { %3945 = vmatpush3.msra.mxu1 %v2847_v19 }
 0xc4a   :  { %v2823_v10 = vsel %vm1945_vm9, %v5154_v8, 0.0  ;;  %3946 = vmatprep.subr.mxu1 %v4017_v0 }
 0xc4b   :  { %2824 = vadd.xlane.f32.xlu0 %v2823_v10  ;;  %3947 = vmatpush3.msra.mxu1 %v2846_v22 }
 0xc4c   :  { %3970 = vmatprep.subr.mxu1 %v4017_v0 }
 0xcd4   :  { %v2825_v12 = vpop.xlane.xlu0 %2824 }
 0xcd5   :  { %v2826_v14 = vmul.f32 0.03125, %v2825_v12 }
 0xcd7   :  { %v2827_v16 = vsub.f32 %v5154_v8, %v2826_v14 }
 0xcd9   :  { %v2828_v18 = vmul.f32 %v2827_v16, %v2827_v16 }
 0xcdb   :  { %v2829_v20 = vsel %vm1945_vm9, %v2828_v18, 0.0 }
 0xcdc   :  { %2830 = vadd.xlane.f32.xlu1 %v2829_v20 }
 0xd65   :  { %v2831_v7 = vpop.xlane.xlu1 %2830 }
 0xd66   :  { %v2832_v9 = vmul.f32 0.03125, %v2831_v7 }
 0xd68   :  { %v2833_v11 = vadd.f32 1e-05, %v2832_v9 }
 0xd6a   :  { %4015 = vrsqrt.f32 %v2833_v11 }
 0xd77   :  { %v4016_v26 = vpop.eup %4015 }
 0xd78   :  { %v2835_v28 = vmul.f32 %v4016_v26, %v2827_v16 }
 0xd7a   :  { %v2840_v30 = vmul.f32 %v3199_v27, %v2835_v28 }
 0xd7c   :  { %v2845_v31 = vadd.f32 %v3200_v29, %v2840_v30 }
 0xd7e   :  { %3949 = vmatmul.mubr.msk.f32.vlgmr.msra.gmra.mxu1 %vm1945_vm9, %v2845_v31 }
 0xd7f   :  { %3978 = vmatprep.mubr.msk.f32.mxu1 %vm4018_vm1, %v4017_v0  ;;  %3971 = vmatpush3.msra.mxu1 %v3021_v35 }
 0xd80   :  { %3972 = vmatprep.subr.mxu1 %v4017_v0 }
 0xd81   :  { %3973 = vmatpush3.msra.mxu1 %v3020_v37 }
 0xd82   :  { %3974 = vmatprep.subr.mxu1 %v4017_v0 }
 0xd83   :  { %3975 = vmatpush3.msra.mxu1 %v3019_v47 }
 0xd84   :  { %3976 = vmatprep.subr.mxu1 %v4017_v0 }
 0xd85   :  { %3977 = vmatpush3.msra.mxu1 %v3018_v50 }
 0xe3e   :  { %v2924_v36 = vpop.f32.mrf.mxu1 }
 0xe3f   :  { %v2925_v42 = vadd.f32 %v3201_v43, %v2924_v36 }
 0xe40   :  { %v3950_v38 = vpop.f32.mrf.mxu1 }
 0xe41   :  { %v2928_v46 = vmax.f32 %v2925_v42, 0.0 }
 0xe43   :  { %3968 = vmatmul.mubr.msk.f32.vlgmr.msra.gmra.mxu0 %vm2937_vm12, %v2928_v46 }
 0xf03   :  { %v3007_v51 = vpop.f32.mrf.mxu0 }
 0xf04   :  { %v3011_v55 = vadd.f32 %v3007_v51, %v5154_v8 }
 0xf05   :  { %v3969_v58 = vpop.f32.mrf.mxu0 }
 0xf06   :  { %v3017_v59 = vadd.f32 %v3204_v54, %v3011_v55 }
 0xf08   :  { %3979 = vmatmul.mubr.msk.f32.vlgmr.msra.gmra.mxu1 %vm1945_vm9, %v3017_v59 }
 0xfc8   :  { %v3096_v63 = vpop.f32.mrf.mxu1 }
 0xfc9   :  { %v3097_v61 = vadd.f32 %v3205_v62, %v3096_v63 }
 0xfca   :  { %v3980_v1 = vpop.f32.mrf.mxu1 }
 0xfcb   :  { %3100 = vst [vmem:[%s5248_s3] sm:$0xff] %v3097_v61 }

</bundles_post_ra>
